<compile_context>
chip_gen: v6e
topology: v6e:2x2x1
jax: 0.10.0
libtpu: 0.0.40
codegen_flags: <defaults>
</compile_context>

<pallas_src>
import jax
import jax.numpy as jnp
import numpy as np
from jax.experimental import pallas as pl

# ---------------- module configuration (matches the PyTorch ResBlockMAE instance) -------------
IN_CH, OUT_CH, KSIZE, PAD, SEQ_LEN, BATCH = 4, 8, 3, 1, 16, 2
USE_RELU = True
EPS = 1e-5                       # nn.LayerNorm default
CMAX = max(IN_CH, OUT_CH)        # channels zero-padded to a common count -> 8-aligned concats
WCOLS = KSIZE * CMAX             # flattened (tap, channel) contraction width
P = BATCH * SEQ_LEN              # batch folded into the lane dim
_PREC = jax.lax.Precision.HIGHEST  # Mosaic dot lowering supports only DEFAULT / HIGHEST

assert KSIZE == 3 and PAD == 1, "kernel assumes the (-1, +1) non-center taps of a 3-tap conv"


# =====================================  the kernel  ==========================================

def resblock_kernel(rhs_ref, w_ref, b_ref, ln_ref, sh_ref, mask_ref, o_ref):
    f32 = jnp.float32
    rhs_x = rhs_ref[...].astype(f32)        # (WCOLS, P)   im2col of x, built in the wrapper
    sfused = sh_ref[...].astype(f32)        # (P, 2P)      [S_-1 | S_+1], sample-boundary aware
    masks = mask_ref[...].astype(f32)       # (BATCH, P)   per-sample lane masks
    inv_cnt = 1.0 / (OUT_CH * SEQ_LEN)      # LayerNorm((OUT_CH, SEQ_LEN)) per sample

    def mm(a, b):
        return jnp.dot(a, b, preferred_element_type=f32, precision=_PREC)

    def im2col(h):
        # One fused shift matmul: (CMAX, P) @ (P, 2P) -> [h@S_-1 | h@S_+1], then stack the
        # three taps on the contraction (sublane) dim.  Shift + zero-pad + boundary mask are
        # all baked into sfused.
        hs = mm(h, sfused)                                          # (CMAX, 2P)
        return jnp.concatenate([hs[:, :P], h, hs[:, P:]], axis=0)   # (KSIZE*CMAX, P)

    def layernorm(h, idx):
        # Per-sample LayerNorm over (OUT_CH, SEQ_LEN), batch folded into lanes.
        # sum and sum-of-squares share one lane reduction via concat([h, h*h]).
        g = ln_ref[2 * idx].astype(f32)
        t = ln_ref[2 * idx + 1].astype(f32)
        hh = jnp.concatenate([h, h * h], axis=0)        # (2*OUT_CH, P)
        mean_row = jnp.zeros((1, P), f32)
        inv_row = jnp.zeros((1, P), f32)
        for n in range(BATCH):                          # static unroll over the batch
            m = masks[n:n + 1, :]                       # (1, P)
            r = jnp.sum(hh * m, axis=1, keepdims=True)  # single lane reduction -> (2*OUT_CH, 1)
            s = jnp.sum(r[:OUT_CH], axis=0, keepdims=True)
            ss = jnp.sum(r[OUT_CH:], axis=0, keepdims=True)
            mu = s * inv_cnt
            var = jnp.maximum(ss * inv_cnt - mu * mu, 0.0)
            mean_row = mean_row + m * mu
            inv_row = inv_row + m * jax.lax.rsqrt(var + EPS)
        return (h - mean_row) * inv_row * g + t

    # ---- fused [conv1 ; identity 1x1]: one (2*OUT_CH, WCOLS) @ (WCOLS, P) matmul, shared RHS
    y0 = mm(w_ref[0].astype(f32), rhs_x) + b_ref[0].astype(f32)     # (2*OUT_CH, P)
    h = y0[:OUT_CH]
    ident = y0[OUT_CH:]

    # ---- main branch: LN -> ReLU -> conv -> LN -> ReLU -> conv -> LN [-> ReLU] ----
    h = jnp.maximum(layernorm(h, 0), 0.0)
    h = mm(w_ref[1].astype(f32)[:OUT_CH], im2col(h)) + b_ref[1].astype(f32)[:OUT_CH]
    h = jnp.maximum(layernorm(h, 1), 0.0)
    h = mm(w_ref[2].astype(f32)[:OUT_CH], im2col(h)) + b_ref[2].astype(f32)[:OUT_CH]
    h = layernorm(h, 2)
    if USE_RELU:
        h = jnp.maximum(h, 0.0)
    # TODO(synk): dropout path omitted -- the module is instantiated with p_dropout=None.

    # ---- identity branch: LN of the fused 1x1-conv result ----
    ident = layernorm(ident, 3)

    out = h + ident
    if USE_RELU:
        out = jnp.maximum(out, 0.0)
    o_ref[...] = out.astype(o_ref.dtype)


# ====================================  host-side packing  =====================================

def _flatten_conv_w(W):
    """PyTorch Conv1d weight (Cout, Cin, K) -> (Cout, K*CMAX) matching the im2col row layout
    rhs[k*CMAX + c] (input channels zero-padded to CMAX)."""
    Cout, Cin, K = W.shape
    Wp = jnp.pad(W, ((0, 0), (0, CMAX - Cin), (0, 0)))          # (Cout, CMAX, K)
    return jnp.transpose(Wp, (0, 2, 1)).reshape(Cout, K * CMAX)


def _layout_constants():
    """Segment masks + fused [S_-1 | S_+1] shift matrix (compile-time constants of the layout)."""
    S = np.zeros((2, P, P), np.float32)          # S_d[q, p] = 1  <=>  q == p + d, same sample
    masks = np.zeros((BATCH, P), np.float32)
    for n in range(BATCH):
        lo, hi = n * SEQ_LEN, (n + 1) * SEQ_LEN
        masks[n, lo:hi] = 1.0
        for p in range(lo, hi):
            for i, d in enumerate((-1, 1)):
                q = p + d
                if lo <= q < hi:
                    S[i, q, p] = 1.0
    sfused = np.concatenate([S[0], S[1]], axis=1)                # (P, 2P)
    return jnp.asarray(sfused), jnp.asarray(masks)


def pack_params(W1, B1, G1, T1, W2, B2, G2, T2, W3, B3, G3, T3, Wid, Bid, Gid, Tid):
    """Pack the 16 parameter tensors + layout constants ONCE (call at module init)."""
    # Identity 1x1 conv stored as the center tap of a K-tap conv so it reuses the input im2col.
    Wid_k = jnp.pad(Wid, ((0, 0), (0, 0), (PAD, KSIZE - 1 - PAD)))
    w0 = jnp.concatenate([_flatten_conv_w(W1), _flatten_conv_w(Wid_k)], axis=0)  # (16, WCOLS)
    w1 = jnp.pad(_flatten_conv_w(W2), ((0, OUT_CH), (0, 0)))                     # (16, WCOLS)
    w2 = jnp.pad(_flatten_conv_w(W3), ((0, OUT_CH), (0, 0)))
    wslab = jnp.stack([w0, w1, w2], axis=0)                                      # (3, 16, WCOLS)

    b0 = jnp.concatenate([B1, Bid], axis=0)[:, None]                             # (16, 1)
    b1 = jnp.pad(B2[:, None], ((0, OUT_CH), (0, 0)))
    b2 = jnp.pad(B3[:, None], ((0, OUT_CH), (0, 0)))
    bslab = jnp.stack([b0, b1, b2], axis=0)                                      # (3, 16, 1)

    tile = lambda a: jnp.tile(a, (1, BATCH))                                     # (OUT_CH, P)
    lnslab = jnp.stack([tile(G1), tile(T1), tile(G2), tile(T2),
                        tile(G3), tile(T3), tile(Gid), tile(Tid)], axis=0)       # (8, OUT_CH, P)

    sfused, masks = _layout_constants()
    return wslab, bslab, lnslab, sfused, masks


def _full_spec(shape):
    nd = len(shape)
    return pl.BlockSpec(shape, lambda *_, _nd=nd: (0,) * _nd)


@jax.jit
def resblock_mae(x, wslab, bslab, lnslab, sfused, masks):
    N, Cin, L = x.shape
    # im2col of the input (zero-padded conv taps, channel-padded to CMAX), batch folded into lanes
    xp = jnp.pad(x, ((0, 0), (0, CMAX - Cin), (0, 0)))                 # (N, CMAX, L)
    xpp = jnp.pad(xp, ((0, 0), (0, 0), (PAD, PAD)))                    # (N, CMAX, L + 2*PAD)
    pieces = [xpp[:, :, k:k + L] for k in range(KSIZE)]
    rhs = jnp.concatenate(pieces, axis=1)                              # (N, WCOLS, L)
    rhs = jnp.transpose(rhs, (1, 0, 2)).reshape(WCOLS, N * L)          # (WCOLS, P)

    out = pl.pallas_call(
        resblock_kernel,
        out_shape=jax.ShapeDtypeStruct((OUT_CH, N * L), x.dtype),
        in_specs=[_full_spec(a.shape) for a in (rhs, wslab, bslab, lnslab, sfused, masks)],
        out_specs=_full_spec((OUT_CH, N * L)),
    )(rhs, wslab, bslab, lnslab, sfused, masks)

    return jnp.transpose(out.reshape(OUT_CH, N, L), (1, 0, 2))         # back to (N, OUT_CH, L)


# ---------------- pure-JAX reference (mirrors the PyTorch forward) ----------------

def _ref_conv(h, W, B):                       # W: (Cout, Cin, K), PyTorch layout
    K = W.shape[-1]
    L = h.shape[-1]
    xp = jnp.pad(h, ((0, 0), (0, 0), (PAD, PAD)))
    y = sum(jnp.einsum('oc,ncl->nol', W[:, :, k], xp[:, :, k:k + L], precision=_PREC)
            for k in range(K))
    return y + B[None, :, None]


def _ref_ln(h, g, b):
    mu = h.mean(axis=(1, 2), keepdims=True)
    var = ((h - mu) ** 2).mean(axis=(1, 2), keepdims=True)
    return (h - mu) / jnp.sqrt(var + EPS) * g[None] + b[None]


def ref_forward(x, W1, B1, G1, T1, W2, B2, G2, T2, W3, B3, G3, T3, Wid, Bid, Gid, Tid):
    h = jnp.maximum(_ref_ln(_ref_conv(x, W1, B1), G1, T1), 0.0)
    h = jnp.maximum(_ref_ln(_ref_conv(h, W2, B2), G2, T2), 0.0)
    h = _ref_ln(_ref_conv(h, W3, B3), G3, T3)
    if USE_RELU:
        h = jnp.maximum(h, 0.0)
    ident = _ref_ln(jnp.einsum('oc,ncl->nol', Wid[:, :, 0], x, precision=_PREC)
                    + Bid[None, :, None], Gid, Tid)
    out = h + ident
    return jnp.maximum(out, 0.0) if USE_RELU else out


# ---------------- main ----------------

if __name__ == "__main__":
    key = jax.random.PRNGKey(0)
    keys = iter(jax.random.split(key, 32))

    def rnd(shape, scale=0.2):
        return jax.random.normal(next(keys), shape, jnp.float32) * scale

    # Parameters (PyTorch shapes), deterministic synthetic init.
    W1 = rnd((OUT_CH, IN_CH, KSIZE));   B1 = rnd((OUT_CH,))
    G1 = 1.0 + rnd((OUT_CH, SEQ_LEN));  T1 = rnd((OUT_CH, SEQ_LEN))
    W2 = rnd((OUT_CH, OUT_CH, KSIZE));  B2 = rnd((OUT_CH,))
    G2 = 1.0 + rnd((OUT_CH, SEQ_LEN));  T2 = rnd((OUT_CH, SEQ_LEN))
    W3 = rnd((OUT_CH, OUT_CH, KSIZE));  B3 = rnd((OUT_CH,))
    G3 = 1.0 + rnd((OUT_CH, SEQ_LEN));  T3 = rnd((OUT_CH, SEQ_LEN))
    Wid = rnd((OUT_CH, IN_CH, 1));      Bid = rnd((OUT_CH,))
    Gid = 1.0 + rnd((OUT_CH, SEQ_LEN)); Tid = rnd((OUT_CH, SEQ_LEN))

    x = jax.random.normal(next(keys), (BATCH, IN_CH, SEQ_LEN), jnp.float32)

    params = (W1, B1, G1, T1, W2, B2, G2, T2, W3, B3, G3, T3, Wid, Bid, Gid, Tid)

    # Parameters are packed once (module init); the jitted forward only does layout + the kernel.
    packed = pack_params(*params)

    out = resblock_mae(x, *packed)
    out = jax.block_until_ready(out)

    ref = ref_forward(x, *params)
    np.testing.assert_allclose(np.asarray(out), np.asarray(ref), rtol=2e-4, atol=2e-4)

    print("KERNEL_OK")
</pallas_src>

<mosaic_0001>
module attributes {stable_mosaic.version = 11 : i64} {
  func.func @resblock_kernel(%arg0: memref<24x32xf32, #tpu.memory_space<vmem>>, %arg1: memref<3x16x24xf32, #tpu.memory_space<vmem>>, %arg2: memref<3x16x1xf32, #tpu.memory_space<vmem>>, %arg3: memref<8x8x32xf32, #tpu.memory_space<vmem>>, %arg4: memref<32x64xf32, #tpu.memory_space<vmem>>, %arg5: memref<2x32xf32, #tpu.memory_space<vmem>>, %arg6: memref<8x32xf32, #tpu.memory_space<vmem>>) attributes {dimension_semantics = [], scalar_prefetch = 0 : i64, scratch_operands = 0 : i64, tpu.core_type = #tpu.core_type<tc>} {
    %c0 = arith.constant 0 : index
    %c0_0 = arith.constant 0 : index
    %0 = vector.load %arg0[%c0, %c0_0] : memref<24x32xf32, #tpu.memory_space<vmem>>, vector<24x32xf32>
    %c0_1 = arith.constant 0 : index
    %c0_2 = arith.constant 0 : index
    %1 = vector.load %arg4[%c0_1, %c0_2] : memref<32x64xf32, #tpu.memory_space<vmem>>, vector<32x64xf32>
    %c0_3 = arith.constant 0 : index
    %c0_4 = arith.constant 0 : index
    %2 = vector.load %arg5[%c0_3, %c0_4] : memref<2x32xf32, #tpu.memory_space<vmem>>, vector<2x32xf32>
    %c0_5 = arith.constant 0 : index
    %c0_6 = arith.constant 0 : index
    %c0_7 = arith.constant 0 : index
    %3 = vector.load %arg1[%c0_5, %c0_6, %c0_7] : memref<3x16x24xf32, #tpu.memory_space<vmem>>, vector<1x16x24xf32>
    %4 = vector.shape_cast %3 : vector<1x16x24xf32> to vector<16x24xf32>
    %cst = arith.constant dense<0.000000e+00> : vector<16x32xf32>
    %5 = tpu.matmul %4, %0, %cst {dimension_numbers = #tpu.dot_dimension_numbers<[1], [0], [0], [1], [0, 0, 1, 1], [], []>, precision = #tpu.contract_precision<fp32>} : vector<16x24xf32>, vector<24x32xf32>, vector<16x32xf32> -> vector<16x32xf32>
    %c0_8 = arith.constant 0 : index
    %c0_9 = arith.constant 0 : index
    %c0_10 = arith.constant 0 : index
    %6 = vector.load %arg2[%c0_8, %c0_9, %c0_10] : memref<3x16x1xf32, #tpu.memory_space<vmem>>, vector<1x16x1xf32>
    %7 = vector.shape_cast %6 : vector<1x16x1xf32> to vector<16x1xf32>
    %8 = vector.broadcast %7 : vector<16x1xf32> to vector<16x32xf32>
    %9 = arith.addf %5, %8 : vector<16x32xf32>
    %10 = vector.extract_strided_slice %9 {offsets = [0, 0], sizes = [8, 32], strides = [1, 1]} : vector<16x32xf32> to vector<8x32xf32>
    %11 = vector.extract_strided_slice %9 {offsets = [8, 0], sizes = [8, 32], strides = [1, 1]} : vector<16x32xf32> to vector<8x32xf32>
    %c0_11 = arith.constant 0 : index
    %c0_12 = arith.constant 0 : index
    %c0_13 = arith.constant 0 : index
    %12 = vector.load %arg3[%c0_11, %c0_12, %c0_13] : memref<8x8x32xf32, #tpu.memory_space<vmem>>, vector<1x8x32xf32>
    %13 = vector.shape_cast %12 : vector<1x8x32xf32> to vector<8x32xf32>
    %c1 = arith.constant 1 : index
    %c0_14 = arith.constant 0 : index
    %c0_15 = arith.constant 0 : index
    %14 = vector.load %arg3[%c1, %c0_14, %c0_15] : memref<8x8x32xf32, #tpu.memory_space<vmem>>, vector<1x8x32xf32>
    %15 = vector.shape_cast %14 : vector<1x8x32xf32> to vector<8x32xf32>
    %16 = arith.mulf %10, %10 : vector<8x32xf32>
    %17 = tpu.concatenate %10, %16 in 0 : vector<8x32xf32>, vector<8x32xf32> -> vector<16x32xf32>
    %cst_16 = arith.constant 0.000000e+00 : f32
    %18 = vector.broadcast %cst_16 : f32 to vector<1x32xf32>
    %cst_17 = arith.constant 0.000000e+00 : f32
    %19 = vector.broadcast %cst_17 : f32 to vector<1x32xf32>
    %20 = vector.extract_strided_slice %2 {offsets = [0, 0], sizes = [1, 32], strides = [1, 1]} : vector<2x32xf32> to vector<1x32xf32>
    %21 = vector.broadcast %20 : vector<1x32xf32> to vector<16x32xf32>
    %22 = arith.mulf %17, %21 : vector<16x32xf32>
    %cst_18 = arith.constant dense<0.000000e+00> : vector<16xf32>
    %23 = vector.multi_reduction <add>, %22, %cst_18 [1] : vector<16x32xf32> to vector<16xf32>
    %24 = vector.shape_cast %23 : vector<16xf32> to vector<16x1xf32>
    %25 = vector.extract_strided_slice %24 {offsets = [0, 0], sizes = [8, 1], strides = [1, 1]} : vector<16x1xf32> to vector<8x1xf32>
    %cst_19 = arith.constant dense<0.000000e+00> : vector<1xf32>
    %26 = vector.multi_reduction <add>, %25, %cst_19 [0] : vector<8x1xf32> to vector<1xf32>
    %27 = vector.shape_cast %26 : vector<1xf32> to vector<1x1xf32>
    %28 = vector.extract_strided_slice %24 {offsets = [8, 0], sizes = [8, 1], strides = [1, 1]} : vector<16x1xf32> to vector<8x1xf32>
    %cst_20 = arith.constant dense<0.000000e+00> : vector<1xf32>
    %29 = vector.multi_reduction <add>, %28, %cst_20 [0] : vector<8x1xf32> to vector<1xf32>
    %30 = vector.shape_cast %29 : vector<1xf32> to vector<1x1xf32>
    %cst_21 = arith.constant 7.812500e-03 : f32
    %31 = vector.broadcast %cst_21 : f32 to vector<1x1xf32>
    %32 = arith.mulf %27, %31 : vector<1x1xf32>
    %cst_22 = arith.constant 7.812500e-03 : f32
    %33 = vector.broadcast %cst_22 : f32 to vector<1x1xf32>
    %34 = arith.mulf %30, %33 : vector<1x1xf32>
    %35 = arith.mulf %32, %32 : vector<1x1xf32>
    %36 = arith.subf %34, %35 : vector<1x1xf32>
    %cst_23 = arith.constant 0.000000e+00 : f32
    %37 = vector.broadcast %cst_23 : f32 to vector<1x1xf32>
    %38 = arith.maximumf %36, %37 : vector<1x1xf32>
    %39 = vector.broadcast %32 : vector<1x1xf32> to vector<1x32xf32>
    %40 = arith.mulf %20, %39 : vector<1x32xf32>
    %41 = arith.addf %18, %40 : vector<1x32xf32>
    %cst_24 = arith.constant 9.99999974E-6 : f32
    %42 = vector.broadcast %cst_24 : f32 to vector<1x1xf32>
    %43 = arith.addf %38, %42 : vector<1x1xf32>
    %44 = math.rsqrt %43 : vector<1x1xf32>
    %45 = vector.broadcast %44 : vector<1x1xf32> to vector<1x32xf32>
    %46 = arith.mulf %20, %45 : vector<1x32xf32>
    %47 = arith.addf %19, %46 : vector<1x32xf32>
    %48 = vector.extract_strided_slice %2 {offsets = [1, 0], sizes = [1, 32], strides = [1, 1]} : vector<2x32xf32> to vector<1x32xf32>
    %49 = vector.broadcast %48 : vector<1x32xf32> to vector<16x32xf32>
    %50 = arith.mulf %17, %49 : vector<16x32xf32>
    %cst_25 = arith.constant dense<0.000000e+00> : vector<16xf32>
    %51 = vector.multi_reduction <add>, %50, %cst_25 [1] : vector<16x32xf32> to vector<16xf32>
    %52 = vector.shape_cast %51 : vector<16xf32> to vector<16x1xf32>
    %53 = vector.extract_strided_slice %52 {offsets = [0, 0], sizes = [8, 1], strides = [1, 1]} : vector<16x1xf32> to vector<8x1xf32>
    %cst_26 = arith.constant dense<0.000000e+00> : vector<1xf32>
    %54 = vector.multi_reduction <add>, %53, %cst_26 [0] : vector<8x1xf32> to vector<1xf32>
    %55 = vector.shape_cast %54 : vector<1xf32> to vector<1x1xf32>
    %56 = vector.extract_strided_slice %52 {offsets = [8, 0], sizes = [8, 1], strides = [1, 1]} : vector<16x1xf32> to vector<8x1xf32>
    %cst_27 = arith.constant dense<0.000000e+00> : vector<1xf32>
    %57 = vector.multi_reduction <add>, %56, %cst_27 [0] : vector<8x1xf32> to vector<1xf32>
    %58 = vector.shape_cast %57 : vector<1xf32> to vector<1x1xf32>
    %cst_28 = arith.constant 7.812500e-03 : f32
    %59 = vector.broadcast %cst_28 : f32 to vector<1x1xf32>
    %60 = arith.mulf %55, %59 : vector<1x1xf32>
    %cst_29 = arith.constant 7.812500e-03 : f32
    %61 = vector.broadcast %cst_29 : f32 to vector<1x1xf32>
    %62 = arith.mulf %58, %61 : vector<1x1xf32>
    %63 = arith.mulf %60, %60 : vector<1x1xf32>
    %64 = arith.subf %62, %63 : vector<1x1xf32>
    %cst_30 = arith.constant 0.000000e+00 : f32
    %65 = vector.broadcast %cst_30 : f32 to vector<1x1xf32>
    %66 = arith.maximumf %64, %65 : vector<1x1xf32>
    %67 = vector.broadcast %60 : vector<1x1xf32> to vector<1x32xf32>
    %68 = arith.mulf %48, %67 : vector<1x32xf32>
    %69 = arith.addf %41, %68 : vector<1x32xf32>
    %cst_31 = arith.constant 9.99999974E-6 : f32
    %70 = vector.broadcast %cst_31 : f32 to vector<1x1xf32>
    %71 = arith.addf %66, %70 : vector<1x1xf32>
    %72 = math.rsqrt %71 : vector<1x1xf32>
    %73 = vector.broadcast %72 : vector<1x1xf32> to vector<1x32xf32>
    %74 = arith.mulf %48, %73 : vector<1x32xf32>
    %75 = arith.addf %47, %74 : vector<1x32xf32>
    %76 = vector.broadcast %69 : vector<1x32xf32> to vector<8x32xf32>
    %77 = arith.subf %10, %76 : vector<8x32xf32>
    %78 = vector.broadcast %75 : vector<1x32xf32> to vector<8x32xf32>
    %79 = arith.mulf %77, %78 : vector<8x32xf32>
    %80 = arith.mulf %79, %13 : vector<8x32xf32>
    %81 = arith.addf %80, %15 : vector<8x32xf32>
    %cst_32 = arith.constant 0.000000e+00 : f32
    %82 = vector.broadcast %cst_32 : f32 to vector<8x32xf32>
    %83 = arith.maximumf %81, %82 : vector<8x32xf32>
    %c1_33 = arith.constant 1 : index
    %c0_34 = arith.constant 0 : index
    %c0_35 = arith.constant 0 : index
    %84 = vector.load %arg1[%c1_33, %c0_34, %c0_35] : memref<3x16x24xf32, #tpu.memory_space<vmem>>, vector<1x16x24xf32>
    %85 = vector.shape_cast %84 : vector<1x16x24xf32> to vector<16x24xf32>
    %86 = vector.extract_strided_slice %85 {offsets = [0, 0], sizes = [8, 24], strides = [1, 1]} : vector<16x24xf32> to vector<8x24xf32>
    %cst_36 = arith.constant dense<0.000000e+00> : vector<8x64xf32>
    %87 = tpu.matmul %83, %1, %cst_36 {dimension_numbers = #tpu.dot_dimension_numbers<[1], [0], [0], [1], [0, 0, 1, 1], [], []>, precision = #tpu.contract_precision<fp32>} : vector<8x32xf32>, vector<32x64xf32>, vector<8x64xf32> -> vector<8x64xf32>
    %88 = vector.extract_strided_slice %87 {offsets = [0, 0], sizes = [8, 32], strides = [1, 1]} : vector<8x64xf32> to vector<8x32xf32>
    %89 = vector.extract_strided_slice %87 {offsets = [0, 32], sizes = [8, 32], strides = [1, 1]} : vector<8x64xf32> to vector<8x32xf32>
    %90 = tpu.concatenate %88, %83, %89 in 0 : vector<8x32xf32>, vector<8x32xf32>, vector<8x32xf32> -> vector<24x32xf32>
    %cst_37 = arith.constant dense<0.000000e+00> : vector<8x32xf32>
    %91 = tpu.matmul %86, %90, %cst_37 {dimension_numbers = #tpu.dot_dimension_numbers<[1], [0], [0], [1], [0, 0, 1, 1], [], []>, precision = #tpu.contract_precision<fp32>} : vector<8x24xf32>, vector<24x32xf32>, vector<8x32xf32> -> vector<8x32xf32>
    %c1_38 = arith.constant 1 : index
    %c0_39 = arith.constant 0 : index
    %c0_40 = arith.constant 0 : index
    %92 = vector.load %arg2[%c1_38, %c0_39, %c0_40] : memref<3x16x1xf32, #tpu.memory_space<vmem>>, vector<1x16x1xf32>
    %93 = vector.shape_cast %92 : vector<1x16x1xf32> to vector<16x1xf32>
    %94 = vector.extract_strided_slice %93 {offsets = [0, 0], sizes = [8, 1], strides = [1, 1]} : vector<16x1xf32> to vector<8x1xf32>
    %95 = vector.broadcast %94 : vector<8x1xf32> to vector<8x32xf32>
    %96 = arith.addf %91, %95 : vector<8x32xf32>
    %c2 = arith.constant 2 : index
    %c0_41 = arith.constant 0 : index
    %c0_42 = arith.constant 0 : index
    %97 = vector.load %arg3[%c2, %c0_41, %c0_42] : memref<8x8x32xf32, #tpu.memory_space<vmem>>, vector<1x8x32xf32>
    %98 = vector.shape_cast %97 : vector<1x8x32xf32> to vector<8x32xf32>
    %c3 = arith.constant 3 : index
    %c0_43 = arith.constant 0 : index
    %c0_44 = arith.constant 0 : index
    %99 = vector.load %arg3[%c3, %c0_43, %c0_44] : memref<8x8x32xf32, #tpu.memory_space<vmem>>, vector<1x8x32xf32>
    %100 = vector.shape_cast %99 : vector<1x8x32xf32> to vector<8x32xf32>
    %101 = arith.mulf %96, %96 : vector<8x32xf32>
    %102 = tpu.concatenate %96, %101 in 0 : vector<8x32xf32>, vector<8x32xf32> -> vector<16x32xf32>
    %cst_45 = arith.constant 0.000000e+00 : f32
    %103 = vector.broadcast %cst_45 : f32 to vector<1x32xf32>
    %cst_46 = arith.constant 0.000000e+00 : f32
    %104 = vector.broadcast %cst_46 : f32 to vector<1x32xf32>
    %105 = vector.extract_strided_slice %2 {offsets = [0, 0], sizes = [1, 32], strides = [1, 1]} : vector<2x32xf32> to vector<1x32xf32>
    %106 = vector.broadcast %105 : vector<1x32xf32> to vector<16x32xf32>
    %107 = arith.mulf %102, %106 : vector<16x32xf32>
    %cst_47 = arith.constant dense<0.000000e+00> : vector<16xf32>
    %108 = vector.multi_reduction <add>, %107, %cst_47 [1] : vector<16x32xf32> to vector<16xf32>
    %109 = vector.shape_cast %108 : vector<16xf32> to vector<16x1xf32>
    %110 = vector.extract_strided_slice %109 {offsets = [0, 0], sizes = [8, 1], strides = [1, 1]} : vector<16x1xf32> to vector<8x1xf32>
    %cst_48 = arith.constant dense<0.000000e+00> : vector<1xf32>
    %111 = vector.multi_reduction <add>, %110, %cst_48 [0] : vector<8x1xf32> to vector<1xf32>
    %112 = vector.shape_cast %111 : vector<1xf32> to vector<1x1xf32>
    %113 = vector.extract_strided_slice %109 {offsets = [8, 0], sizes = [8, 1], strides = [1, 1]} : vector<16x1xf32> to vector<8x1xf32>
    %cst_49 = arith.constant dense<0.000000e+00> : vector<1xf32>
    %114 = vector.multi_reduction <add>, %113, %cst_49 [0] : vector<8x1xf32> to vector<1xf32>
    %115 = vector.shape_cast %114 : vector<1xf32> to vector<1x1xf32>
    %cst_50 = arith.constant 7.812500e-03 : f32
    %116 = vector.broadcast %cst_50 : f32 to vector<1x1xf32>
    %117 = arith.mulf %112, %116 : vector<1x1xf32>
    %cst_51 = arith.constant 7.812500e-03 : f32
    %118 = vector.broadcast %cst_51 : f32 to vector<1x1xf32>
    %119 = arith.mulf %115, %118 : vector<1x1xf32>
    %120 = arith.mulf %117, %117 : vector<1x1xf32>
    %121 = arith.subf %119, %120 : vector<1x1xf32>
    %cst_52 = arith.constant 0.000000e+00 : f32
    %122 = vector.broadcast %cst_52 : f32 to vector<1x1xf32>
    %123 = arith.maximumf %121, %122 : vector<1x1xf32>
    %124 = vector.broadcast %117 : vector<1x1xf32> to vector<1x32xf32>
    %125 = arith.mulf %105, %124 : vector<1x32xf32>
    %126 = arith.addf %103, %125 : vector<1x32xf32>
    %cst_53 = arith.constant 9.99999974E-6 : f32
    %127 = vector.broadcast %cst_53 : f32 to vector<1x1xf32>
    %128 = arith.addf %123, %127 : vector<1x1xf32>
    %129 = math.rsqrt %128 : vector<1x1xf32>
    %130 = vector.broadcast %129 : vector<1x1xf32> to vector<1x32xf32>
    %131 = arith.mulf %105, %130 : vector<1x32xf32>
    %132 = arith.addf %104, %131 : vector<1x32xf32>
    %133 = vector.extract_strided_slice %2 {offsets = [1, 0], sizes = [1, 32], strides = [1, 1]} : vector<2x32xf32> to vector<1x32xf32>
    %134 = vector.broadcast %133 : vector<1x32xf32> to vector<16x32xf32>
    %135 = arith.mulf %102, %134 : vector<16x32xf32>
    %cst_54 = arith.constant dense<0.000000e+00> : vector<16xf32>
    %136 = vector.multi_reduction <add>, %135, %cst_54 [1] : vector<16x32xf32> to vector<16xf32>
    %137 = vector.shape_cast %136 : vector<16xf32> to vector<16x1xf32>
    %138 = vector.extract_strided_slice %137 {offsets = [0, 0], sizes = [8, 1], strides = [1, 1]} : vector<16x1xf32> to vector<8x1xf32>
    %cst_55 = arith.constant dense<0.000000e+00> : vector<1xf32>
    %139 = vector.multi_reduction <add>, %138, %cst_55 [0] : vector<8x1xf32> to vector<1xf32>
    %140 = vector.shape_cast %139 : vector<1xf32> to vector<1x1xf32>
    %141 = vector.extract_strided_slice %137 {offsets = [8, 0], sizes = [8, 1], strides = [1, 1]} : vector<16x1xf32> to vector<8x1xf32>
    %cst_56 = arith.constant dense<0.000000e+00> : vector<1xf32>
    %142 = vector.multi_reduction <add>, %141, %cst_56 [0] : vector<8x1xf32> to vector<1xf32>
    %143 = vector.shape_cast %142 : vector<1xf32> to vector<1x1xf32>
    %cst_57 = arith.constant 7.812500e-03 : f32
    %144 = vector.broadcast %cst_57 : f32 to vector<1x1xf32>
    %145 = arith.mulf %140, %144 : vector<1x1xf32>
    %cst_58 = arith.constant 7.812500e-03 : f32
    %146 = vector.broadcast %cst_58 : f32 to vector<1x1xf32>
    %147 = arith.mulf %143, %146 : vector<1x1xf32>
    %148 = arith.mulf %145, %145 : vector<1x1xf32>
    %149 = arith.subf %147, %148 : vector<1x1xf32>
    %cst_59 = arith.constant 0.000000e+00 : f32
    %150 = vector.broadcast %cst_59 : f32 to vector<1x1xf32>
    %151 = arith.maximumf %149, %150 : vector<1x1xf32>
    %152 = vector.broadcast %145 : vector<1x1xf32> to vector<1x32xf32>
    %153 = arith.mulf %133, %152 : vector<1x32xf32>
    %154 = arith.addf %126, %153 : vector<1x32xf32>
    %cst_60 = arith.constant 9.99999974E-6 : f32
    %155 = vector.broadcast %cst_60 : f32 to vector<1x1xf32>
    %156 = arith.addf %151, %155 : vector<1x1xf32>
    %157 = math.rsqrt %156 : vector<1x1xf32>
    %158 = vector.broadcast %157 : vector<1x1xf32> to vector<1x32xf32>
    %159 = arith.mulf %133, %158 : vector<1x32xf32>
    %160 = arith.addf %132, %159 : vector<1x32xf32>
    %161 = vector.broadcast %154 : vector<1x32xf32> to vector<8x32xf32>
    %162 = arith.subf %96, %161 : vector<8x32xf32>
    %163 = vector.broadcast %160 : vector<1x32xf32> to vector<8x32xf32>
    %164 = arith.mulf %162, %163 : vector<8x32xf32>
    %165 = arith.mulf %164, %98 : vector<8x32xf32>
    %166 = arith.addf %165, %100 : vector<8x32xf32>
    %cst_61 = arith.constant 0.000000e+00 : f32
    %167 = vector.broadcast %cst_61 : f32 to vector<8x32xf32>
    %168 = arith.maximumf %166, %167 : vector<8x32xf32>
    %c2_62 = arith.constant 2 : index
    %c0_63 = arith.constant 0 : index
    %c0_64 = arith.constant 0 : index
    %169 = vector.load %arg1[%c2_62, %c0_63, %c0_64] : memref<3x16x24xf32, #tpu.memory_space<vmem>>, vector<1x16x24xf32>
    %170 = vector.shape_cast %169 : vector<1x16x24xf32> to vector<16x24xf32>
    %171 = vector.extract_strided_slice %170 {offsets = [0, 0], sizes = [8, 24], strides = [1, 1]} : vector<16x24xf32> to vector<8x24xf32>
    %cst_65 = arith.constant dense<0.000000e+00> : vector<8x64xf32>
    %172 = tpu.matmul %168, %1, %cst_65 {dimension_numbers = #tpu.dot_dimension_numbers<[1], [0], [0], [1], [0, 0, 1, 1], [], []>, precision = #tpu.contract_precision<fp32>} : vector<8x32xf32>, vector<32x64xf32>, vector<8x64xf32> -> vector<8x64xf32>
    %173 = vector.extract_strided_slice %172 {offsets = [0, 0], sizes = [8, 32], strides = [1, 1]} : vector<8x64xf32> to vector<8x32xf32>
    %174 = vector.extract_strided_slice %172 {offsets = [0, 32], sizes = [8, 32], strides = [1, 1]} : vector<8x64xf32> to vector<8x32xf32>
    %175 = tpu.concatenate %173, %168, %174 in 0 : vector<8x32xf32>, vector<8x32xf32>, vector<8x32xf32> -> vector<24x32xf32>
    %cst_66 = arith.constant dense<0.000000e+00> : vector<8x32xf32>
    %176 = tpu.matmul %171, %175, %cst_66 {dimension_numbers = #tpu.dot_dimension_numbers<[1], [0], [0], [1], [0, 0, 1, 1], [], []>, precision = #tpu.contract_precision<fp32>} : vector<8x24xf32>, vector<24x32xf32>, vector<8x32xf32> -> vector<8x32xf32>
    %c2_67 = arith.constant 2 : index
    %c0_68 = arith.constant 0 : index
    %c0_69 = arith.constant 0 : index
    %177 = vector.load %arg2[%c2_67, %c0_68, %c0_69] : memref<3x16x1xf32, #tpu.memory_space<vmem>>, vector<1x16x1xf32>
    %178 = vector.shape_cast %177 : vector<1x16x1xf32> to vector<16x1xf32>
    %179 = vector.extract_strided_slice %178 {offsets = [0, 0], sizes = [8, 1], strides = [1, 1]} : vector<16x1xf32> to vector<8x1xf32>
    %180 = vector.broadcast %179 : vector<8x1xf32> to vector<8x32xf32>
    %181 = arith.addf %176, %180 : vector<8x32xf32>
    %c4 = arith.constant 4 : index
    %c0_70 = arith.constant 0 : index
    %c0_71 = arith.constant 0 : index
    %182 = vector.load %arg3[%c4, %c0_70, %c0_71] : memref<8x8x32xf32, #tpu.memory_space<vmem>>, vector<1x8x32xf32>
    %183 = vector.shape_cast %182 : vector<1x8x32xf32> to vector<8x32xf32>
    %c5 = arith.constant 5 : index
    %c0_72 = arith.constant 0 : index
    %c0_73 = arith.constant 0 : index
    %184 = vector.load %arg3[%c5, %c0_72, %c0_73] : memref<8x8x32xf32, #tpu.memory_space<vmem>>, vector<1x8x32xf32>
    %185 = vector.shape_cast %184 : vector<1x8x32xf32> to vector<8x32xf32>
    %186 = arith.mulf %181, %181 : vector<8x32xf32>
    %187 = tpu.concatenate %181, %186 in 0 : vector<8x32xf32>, vector<8x32xf32> -> vector<16x32xf32>
    %cst_74 = arith.constant 0.000000e+00 : f32
    %188 = vector.broadcast %cst_74 : f32 to vector<1x32xf32>
    %cst_75 = arith.constant 0.000000e+00 : f32
    %189 = vector.broadcast %cst_75 : f32 to vector<1x32xf32>
    %190 = vector.extract_strided_slice %2 {offsets = [0, 0], sizes = [1, 32], strides = [1, 1]} : vector<2x32xf32> to vector<1x32xf32>
    %191 = vector.broadcast %190 : vector<1x32xf32> to vector<16x32xf32>
    %192 = arith.mulf %187, %191 : vector<16x32xf32>
    %cst_76 = arith.constant dense<0.000000e+00> : vector<16xf32>
    %193 = vector.multi_reduction <add>, %192, %cst_76 [1] : vector<16x32xf32> to vector<16xf32>
    %194 = vector.shape_cast %193 : vector<16xf32> to vector<16x1xf32>
    %195 = vector.extract_strided_slice %194 {offsets = [0, 0], sizes = [8, 1], strides = [1, 1]} : vector<16x1xf32> to vector<8x1xf32>
    %cst_77 = arith.constant dense<0.000000e+00> : vector<1xf32>
    %196 = vector.multi_reduction <add>, %195, %cst_77 [0] : vector<8x1xf32> to vector<1xf32>
    %197 = vector.shape_cast %196 : vector<1xf32> to vector<1x1xf32>
    %198 = vector.extract_strided_slice %194 {offsets = [8, 0], sizes = [8, 1], strides = [1, 1]} : vector<16x1xf32> to vector<8x1xf32>
    %cst_78 = arith.constant dense<0.000000e+00> : vector<1xf32>
    %199 = vector.multi_reduction <add>, %198, %cst_78 [0] : vector<8x1xf32> to vector<1xf32>
    %200 = vector.shape_cast %199 : vector<1xf32> to vector<1x1xf32>
    %cst_79 = arith.constant 7.812500e-03 : f32
    %201 = vector.broadcast %cst_79 : f32 to vector<1x1xf32>
    %202 = arith.mulf %197, %201 : vector<1x1xf32>
    %cst_80 = arith.constant 7.812500e-03 : f32
    %203 = vector.broadcast %cst_80 : f32 to vector<1x1xf32>
    %204 = arith.mulf %200, %203 : vector<1x1xf32>
    %205 = arith.mulf %202, %202 : vector<1x1xf32>
    %206 = arith.subf %204, %205 : vector<1x1xf32>
    %cst_81 = arith.constant 0.000000e+00 : f32
    %207 = vector.broadcast %cst_81 : f32 to vector<1x1xf32>
    %208 = arith.maximumf %206, %207 : vector<1x1xf32>
    %209 = vector.broadcast %202 : vector<1x1xf32> to vector<1x32xf32>
    %210 = arith.mulf %190, %209 : vector<1x32xf32>
    %211 = arith.addf %188, %210 : vector<1x32xf32>
    %cst_82 = arith.constant 9.99999974E-6 : f32
    %212 = vector.broadcast %cst_82 : f32 to vector<1x1xf32>
    %213 = arith.addf %208, %212 : vector<1x1xf32>
    %214 = math.rsqrt %213 : vector<1x1xf32>
    %215 = vector.broadcast %214 : vector<1x1xf32> to vector<1x32xf32>
    %216 = arith.mulf %190, %215 : vector<1x32xf32>
    %217 = arith.addf %189, %216 : vector<1x32xf32>
    %218 = vector.extract_strided_slice %2 {offsets = [1, 0], sizes = [1, 32], strides = [1, 1]} : vector<2x32xf32> to vector<1x32xf32>
    %219 = vector.broadcast %218 : vector<1x32xf32> to vector<16x32xf32>
    %220 = arith.mulf %187, %219 : vector<16x32xf32>
    %cst_83 = arith.constant dense<0.000000e+00> : vector<16xf32>
    %221 = vector.multi_reduction <add>, %220, %cst_83 [1] : vector<16x32xf32> to vector<16xf32>
    %222 = vector.shape_cast %221 : vector<16xf32> to vector<16x1xf32>
    %223 = vector.extract_strided_slice %222 {offsets = [0, 0], sizes = [8, 1], strides = [1, 1]} : vector<16x1xf32> to vector<8x1xf32>
    %cst_84 = arith.constant dense<0.000000e+00> : vector<1xf32>
    %224 = vector.multi_reduction <add>, %223, %cst_84 [0] : vector<8x1xf32> to vector<1xf32>
    %225 = vector.shape_cast %224 : vector<1xf32> to vector<1x1xf32>
    %226 = vector.extract_strided_slice %222 {offsets = [8, 0], sizes = [8, 1], strides = [1, 1]} : vector<16x1xf32> to vector<8x1xf32>
    %cst_85 = arith.constant dense<0.000000e+00> : vector<1xf32>
    %227 = vector.multi_reduction <add>, %226, %cst_85 [0] : vector<8x1xf32> to vector<1xf32>
    %228 = vector.shape_cast %227 : vector<1xf32> to vector<1x1xf32>
    %cst_86 = arith.constant 7.812500e-03 : f32
    %229 = vector.broadcast %cst_86 : f32 to vector<1x1xf32>
    %230 = arith.mulf %225, %229 : vector<1x1xf32>
    %cst_87 = arith.constant 7.812500e-03 : f32
    %231 = vector.broadcast %cst_87 : f32 to vector<1x1xf32>
    %232 = arith.mulf %228, %231 : vector<1x1xf32>
    %233 = arith.mulf %230, %230 : vector<1x1xf32>
    %234 = arith.subf %232, %233 : vector<1x1xf32>
    %cst_88 = arith.constant 0.000000e+00 : f32
    %235 = vector.broadcast %cst_88 : f32 to vector<1x1xf32>
    %236 = arith.maximumf %234, %235 : vector<1x1xf32>
    %237 = vector.broadcast %230 : vector<1x1xf32> to vector<1x32xf32>
    %238 = arith.mulf %218, %237 : vector<1x32xf32>
    %239 = arith.addf %211, %238 : vector<1x32xf32>
    %cst_89 = arith.constant 9.99999974E-6 : f32
    %240 = vector.broadcast %cst_89 : f32 to vector<1x1xf32>
    %241 = arith.addf %236, %240 : vector<1x1xf32>
    %242 = math.rsqrt %241 : vector<1x1xf32>
    %243 = vector.broadcast %242 : vector<1x1xf32> to vector<1x32xf32>
    %244 = arith.mulf %218, %243 : vector<1x32xf32>
    %245 = arith.addf %217, %244 : vector<1x32xf32>
    %246 = vector.broadcast %239 : vector<1x32xf32> to vector<8x32xf32>
    %247 = arith.subf %181, %246 : vector<8x32xf32>
    %248 = vector.broadcast %245 : vector<1x32xf32> to vector<8x32xf32>
    %249 = arith.mulf %247, %248 : vector<8x32xf32>
    %250 = arith.mulf %249, %183 : vector<8x32xf32>
    %251 = arith.addf %250, %185 : vector<8x32xf32>
    %cst_90 = arith.constant 0.000000e+00 : f32
    %252 = vector.broadcast %cst_90 : f32 to vector<8x32xf32>
    %253 = arith.maximumf %251, %252 : vector<8x32xf32>
    %c6 = arith.constant 6 : index
    %c0_91 = arith.constant 0 : index
    %c0_92 = arith.constant 0 : index
    %254 = vector.load %arg3[%c6, %c0_91, %c0_92] : memref<8x8x32xf32, #tpu.memory_space<vmem>>, vector<1x8x32xf32>
    %255 = vector.shape_cast %254 : vector<1x8x32xf32> to vector<8x32xf32>
    %c7 = arith.constant 7 : index
    %c0_93 = arith.constant 0 : index
    %c0_94 = arith.constant 0 : index
    %256 = vector.load %arg3[%c7, %c0_93, %c0_94] : memref<8x8x32xf32, #tpu.memory_space<vmem>>, vector<1x8x32xf32>
    %257 = vector.shape_cast %256 : vector<1x8x32xf32> to vector<8x32xf32>
    %258 = arith.mulf %11, %11 : vector<8x32xf32>
    %259 = tpu.concatenate %11, %258 in 0 : vector<8x32xf32>, vector<8x32xf32> -> vector<16x32xf32>
    %cst_95 = arith.constant 0.000000e+00 : f32
    %260 = vector.broadcast %cst_95 : f32 to vector<1x32xf32>
    %cst_96 = arith.constant 0.000000e+00 : f32
    %261 = vector.broadcast %cst_96 : f32 to vector<1x32xf32>
    %262 = vector.extract_strided_slice %2 {offsets = [0, 0], sizes = [1, 32], strides = [1, 1]} : vector<2x32xf32> to vector<1x32xf32>
    %263 = vector.broadcast %262 : vector<1x32xf32> to vector<16x32xf32>
    %264 = arith.mulf %259, %263 : vector<16x32xf32>
    %cst_97 = arith.constant dense<0.000000e+00> : vector<16xf32>
    %265 = vector.multi_reduction <add>, %264, %cst_97 [1] : vector<16x32xf32> to vector<16xf32>
    %266 = vector.shape_cast %265 : vector<16xf32> to vector<16x1xf32>
    %267 = vector.extract_strided_slice %266 {offsets = [0, 0], sizes = [8, 1], strides = [1, 1]} : vector<16x1xf32> to vector<8x1xf32>
    %cst_98 = arith.constant dense<0.000000e+00> : vector<1xf32>
    %268 = vector.multi_reduction <add>, %267, %cst_98 [0] : vector<8x1xf32> to vector<1xf32>
    %269 = vector.shape_cast %268 : vector<1xf32> to vector<1x1xf32>
    %270 = vector.extract_strided_slice %266 {offsets = [8, 0], sizes = [8, 1], strides = [1, 1]} : vector<16x1xf32> to vector<8x1xf32>
    %cst_99 = arith.constant dense<0.000000e+00> : vector<1xf32>
    %271 = vector.multi_reduction <add>, %270, %cst_99 [0] : vector<8x1xf32> to vector<1xf32>
    %272 = vector.shape_cast %271 : vector<1xf32> to vector<1x1xf32>
    %cst_100 = arith.constant 7.812500e-03 : f32
    %273 = vector.broadcast %cst_100 : f32 to vector<1x1xf32>
    %274 = arith.mulf %269, %273 : vector<1x1xf32>
    %cst_101 = arith.constant 7.812500e-03 : f32
    %275 = vector.broadcast %cst_101 : f32 to vector<1x1xf32>
    %276 = arith.mulf %272, %275 : vector<1x1xf32>
    %277 = arith.mulf %274, %274 : vector<1x1xf32>
    %278 = arith.subf %276, %277 : vector<1x1xf32>
    %cst_102 = arith.constant 0.000000e+00 : f32
    %279 = vector.broadcast %cst_102 : f32 to vector<1x1xf32>
    %280 = arith.maximumf %278, %279 : vector<1x1xf32>
    %281 = vector.broadcast %274 : vector<1x1xf32> to vector<1x32xf32>
    %282 = arith.mulf %262, %281 : vector<1x32xf32>
    %283 = arith.addf %260, %282 : vector<1x32xf32>
    %cst_103 = arith.constant 9.99999974E-6 : f32
    %284 = vector.broadcast %cst_103 : f32 to vector<1x1xf32>
    %285 = arith.addf %280, %284 : vector<1x1xf32>
    %286 = math.rsqrt %285 : vector<1x1xf32>
    %287 = vector.broadcast %286 : vector<1x1xf32> to vector<1x32xf32>
    %288 = arith.mulf %262, %287 : vector<1x32xf32>
    %289 = arith.addf %261, %288 : vector<1x32xf32>
    %290 = vector.extract_strided_slice %2 {offsets = [1, 0], sizes = [1, 32], strides = [1, 1]} : vector<2x32xf32> to vector<1x32xf32>
    %291 = vector.broadcast %290 : vector<1x32xf32> to vector<16x32xf32>
    %292 = arith.mulf %259, %291 : vector<16x32xf32>
    %cst_104 = arith.constant dense<0.000000e+00> : vector<16xf32>
    %293 = vector.multi_reduction <add>, %292, %cst_104 [1] : vector<16x32xf32> to vector<16xf32>
    %294 = vector.shape_cast %293 : vector<16xf32> to vector<16x1xf32>
    %295 = vector.extract_strided_slice %294 {offsets = [0, 0], sizes = [8, 1], strides = [1, 1]} : vector<16x1xf32> to vector<8x1xf32>
    %cst_105 = arith.constant dense<0.000000e+00> : vector<1xf32>
    %296 = vector.multi_reduction <add>, %295, %cst_105 [0] : vector<8x1xf32> to vector<1xf32>
    %297 = vector.shape_cast %296 : vector<1xf32> to vector<1x1xf32>
    %298 = vector.extract_strided_slice %294 {offsets = [8, 0], sizes = [8, 1], strides = [1, 1]} : vector<16x1xf32> to vector<8x1xf32>
    %cst_106 = arith.constant dense<0.000000e+00> : vector<1xf32>
    %299 = vector.multi_reduction <add>, %298, %cst_106 [0] : vector<8x1xf32> to vector<1xf32>
    %300 = vector.shape_cast %299 : vector<1xf32> to vector<1x1xf32>
    %cst_107 = arith.constant 7.812500e-03 : f32
    %301 = vector.broadcast %cst_107 : f32 to vector<1x1xf32>
    %302 = arith.mulf %297, %301 : vector<1x1xf32>
    %cst_108 = arith.constant 7.812500e-03 : f32
    %303 = vector.broadcast %cst_108 : f32 to vector<1x1xf32>
    %304 = arith.mulf %300, %303 : vector<1x1xf32>
    %305 = arith.mulf %302, %302 : vector<1x1xf32>
    %306 = arith.subf %304, %305 : vector<1x1xf32>
    %cst_109 = arith.constant 0.000000e+00 : f32
    %307 = vector.broadcast %cst_109 : f32 to vector<1x1xf32>
    %308 = arith.maximumf %306, %307 : vector<1x1xf32>
    %309 = vector.broadcast %302 : vector<1x1xf32> to vector<1x32xf32>
    %310 = arith.mulf %290, %309 : vector<1x32xf32>
    %311 = arith.addf %283, %310 : vector<1x32xf32>
    %cst_110 = arith.constant 9.99999974E-6 : f32
    %312 = vector.broadcast %cst_110 : f32 to vector<1x1xf32>
    %313 = arith.addf %308, %312 : vector<1x1xf32>
    %314 = math.rsqrt %313 : vector<1x1xf32>
    %315 = vector.broadcast %314 : vector<1x1xf32> to vector<1x32xf32>
    %316 = arith.mulf %290, %315 : vector<1x32xf32>
    %317 = arith.addf %289, %316 : vector<1x32xf32>
    %318 = vector.broadcast %311 : vector<1x32xf32> to vector<8x32xf32>
    %319 = arith.subf %11, %318 : vector<8x32xf32>
    %320 = vector.broadcast %317 : vector<1x32xf32> to vector<8x32xf32>
    %321 = arith.mulf %319, %320 : vector<8x32xf32>
    %322 = arith.mulf %321, %255 : vector<8x32xf32>
    %323 = arith.addf %322, %257 : vector<8x32xf32>
    %324 = arith.addf %253, %323 : vector<8x32xf32>
    %cst_111 = arith.constant 0.000000e+00 : f32
    %325 = vector.broadcast %cst_111 : f32 to vector<8x32xf32>
    %326 = arith.maximumf %324, %325 : vector<8x32xf32>
    %c0_112 = arith.constant 0 : index
    %c0_113 = arith.constant 0 : index
    %327 = vector.load %arg6[%c0_112, %c0_113] : memref<8x32xf32, #tpu.memory_space<vmem>>, vector<8x32xf32>
    tpu.vector_store %arg6[%c0_112, %c0_113], %326 {strides = array<i32>} : memref<8x32xf32, #tpu.memory_space<vmem>>, vector<8x32xf32>,
    return
  }
}

</mosaic_0001>

<bundles_post_ra>
// kernel: resblock_mae.1
= control target key start
LH: loop header
LB: loop body
LE: loop exit
PB: predicated region body
PF: predicated region fallthrough
CT: control target
= control target key end

     0   :  { %vm45_vm0 = vcmask 195584   ;;  %v3343_v3 = vmov 0   ;;  %v571_v41 = vlaneseq  ;;  %vm577_vm1 = vcmask 261120   ;;  %s3346_s21 = smov 96   ;;  %s3857_s0 = inlined_call_operand.vmem [shape: f32[24,32], index: 0, kind: input, shape index: {}]   ;;  %s3858_s1 = inlined_call_operand.vmem [shape: f32[3,16,24], index: 1, kind: input, shape index: {}]   ;;  %s3859_s2 = inlined_call_operand.vmem [shape: f32[3,16,1], index: 2, kind: input, shape index: {}]   ;;  %s3860_s5 = inlined_call_operand.vmem [shape: f32[2,32], index: 5, kind: input, shape index: {}]   ;;  %s3861_s4 = inlined_call_operand.vmem [shape: f32[32,64], index: 4, kind: input, shape index: {}]   ;;  %s3862_s3 = inlined_call_operand.vmem [shape: f32[8,8,32], index: 3, kind: input, shape index: {}]   ;;  %s3863_s6 = inlined_call_operand.vmem [shape: f32[8,32], index: 6, kind: output, shape index: {}]  }
   0x1   :  { %v25_v0 = vld [vmem:[%s3857_s0 + $0x10] sm:$0xff]  ;;  %v24_v1 = vld [vmem:[%s3857_s0 + $0x8] sm:$0xff]  ;;  %v23_v2 = vld [vmem:[%s3857_s0] sm:$0xff]  ;;  %3324 = vset.pattern.permute.xlu0 %v3343_v3  ;;  %3325 = vset.pattern.permute.xlu1 %v3343_v3  ;;  %vm3345_vm2 = vmmov 0  }
   0x2   :  { %v3391_v4 = vand.u32 4294901760, %v25_v0  ;;  %v3393_v5 = vand.u32 4294901760, %v24_v1  ;;  %v3395_v6 = vand.u32 4294901760, %v23_v2  ;;  %v31_v7 = vld [vmem:[%s3858_s1] sm:$0xff]  ;;  %v32_v8 = vld [vmem:[%s3858_s1 + $0x8] sm:$0xff]  ;;  %v572_v45 = vshrl.u32 %v571_v41, 7 }
   0x3   :  { %v33_v9 = vld [vmem:[%s3859_s2] sm:$0xff]  ;;  %v47_v10 = vsel %vm45_vm0, %v31_v7, 0  ;;  %v50_v11 = vsel %vm45_vm0, %v32_v8, 0  ;;  %v28_v7 = vld [vmem:[%s3861_s4 + $0x10] sm:$0xff]  ;;  %v27_v8 = vld [vmem:[%s3861_s4 + $0x8] sm:$0xff] }
   0x4   :  { %37 = vperm.xlu0 %3324, %v33_v9   ;;  %3026 = vmatprep.subr.mxu0 %v3391_v4  ;;  %v168_v12 = vsub.f32 %v25_v0, %v3391_v4  ;;  %v120_v13 = vand.u32 4294901760, %v47_v10  ;;  %v175_v14 = vsub.f32 %v24_v1, %v3393_v5  ;;  %v3411_v15 = vand.u32 4294901760, %v50_v11  ;;  %v3450_v53 = vld [vmem:[%s3860_s5] sm:$0x3] }
   0x5   :  { %3027 = vmatpush3.msra.mxu0 %v3391_v4  ;;  %v182_v16 = vsub.f32 %v23_v2, %v3395_v6  ;;  %v3445_v50 = vsub.s32 0, %v572_v45  ;;  %v609_v51 = vsub.s32 1, %v572_v45 }
   0x6   :  { %3028 = vmatprep.subr.mxu0 %v3393_v5  ;;  %v169_v17 = vand.u32 4294901760, %v168_v12  ;;  %v121_v18 = vsub.f32 %v47_v10, %v120_v13  ;;  %v176_v19 = vand.u32 4294901760, %v175_v14  ;;  %v131_v20 = vsub.f32 %v50_v11, %v3411_v15  ;;  %3041 = vmatprep.mubr.f32.mxu1 %v120_v13 }
   0x7   :  { %3029 = vmatpush3.msra.mxu0 %v3393_v5  ;;  %v183_v21 = vand.u32 4294901760, %v182_v16  ;;  %v3455_v56 = vrot.slane %v3450_v53, %v609_v51  ;;  %v3459_v57 = vrot.slane %v3450_v53, %v3445_v50  ;;  %v3488_v10 = vand.u32 4294901760, %v28_v7 }
   0x8   :  { %3030 = vmatprep.subr.mxu0 %v3395_v6  ;;  %v170_v22 = vsub.f32 %v168_v12, %v169_v17  ;;  %v122_v23 = vand.u32 4294901760, %v121_v18  ;;  %v177_v24 = vsub.f32 %v175_v14, %v176_v19  ;;  %v132_v25 = vand.u32 4294901760, %v131_v20 }
   0x9   :  { %3031 = vmatpush3.msra.mxu0 %v3395_v6  ;;  %v184_v26 = vsub.f32 %v182_v16, %v183_v21  ;;  %v3490_v11 = vand.u32 4294901760, %v27_v8 }
   0xa   :  { %v171_v27 = vand.u32 4294901760, %v170_v22  ;;  %v123_v28 = vsub.f32 %v121_v18, %v122_v23  ;;  %v178_v29 = vand.u32 4294901760, %v177_v24  ;;  %3044 = vmatprep.subr.mxu0 %v168_v12  ;;  %v133_v30 = vsub.f32 %v131_v20, %v132_v25 }
   0xb   :  { %v185_v33 = vand.u32 4294901760, %v184_v26 }
   0xc   :  { %3035 = vmatprep.subr.mxu1 %v171_v27  ;;  %v124_v31 = vand.u32 4294901760, %v123_v28  ;;  %v134_v32 = vand.u32 4294901760, %v133_v30 }
   0xd   :  { %3036 = vmatpush3.msra.mxu1 %v171_v27 }
   0xe   :  { %3032 = vmatprep.mubr.f32.mxu0 %v124_v31  ;;  %3037 = vmatprep.subr.mxu1 %v178_v29 }
   0xf   :  { %3033 = vmatmul.mubr.f32.vlgmr.msra.gmra.mxu0 %v134_v32  ;;  %3038 = vmatpush3.msra.mxu1 %v178_v29 }
  0x10   :  { %3045 = vmatpush3.msra.mxu0 %v168_v12  ;;  %3039 = vmatprep.subr.mxu1 %v185_v33  ;;  %v26_v12 = vld [vmem:[%s3861_s4] sm:$0xff] }
  0x11   :  { %3046 = vmatprep.subr.mxu0 %v175_v14  ;;  %3040 = vmatpush3.msra.mxu1 %v185_v33 }
  0x12   :  { %3047 = vmatpush3.msra.mxu0 %v175_v14  ;;  %3042 = vmatmul.mubr.f32.vlgmr.msra.gmra.mxu1 %v3411_v15 }
  0x13   :  { %3048 = vmatprep.subr.mxu0 %v182_v16  ;;  %3053 = vmatprep.subr.mxu1 %v3391_v4 }
  0x14   :  { %3049 = vmatpush3.msra.mxu0 %v182_v16  ;;  %3050 = vmatprep.mubr.f32.mxu0 %v121_v18  ;;  %v3508_v16 = vsub.f32 %v27_v8, %v3490_v11 }
  0x15   :  { %3054 = vmatpush3.msra.mxu1 %v3391_v4  ;;  %3051 = vmatmul.mubr.f32.vlgmr.msra.gmra.mxu0 %v131_v20 }
  0x16   :  { %3055 = vmatprep.subr.mxu1 %v3393_v5  ;;  %3062 = vmatprep.subr.mxu0 %v169_v17  ;;  %v3522_v20 = vand.u32 4294901760, %v3508_v16 }
  0x17   :  { %3056 = vmatpush3.msra.mxu1 %v3393_v5  ;;  %3063 = vmatpush3.msra.mxu0 %v169_v17 }
  0x18   :  { %3057 = vmatprep.subr.mxu1 %v3395_v6  ;;  %3064 = vmatprep.subr.mxu0 %v176_v19  ;;  %v787_v24 = vsub.f32 %v3508_v16, %v3522_v20 }
  0x19   :  { %3058 = vmatpush3.msra.mxu1 %v3395_v6  ;;  %3059 = vmatprep.mubr.f32.mxu1 %v122_v23 }
  0x1a   :  { %3065 = vmatpush3.msra.mxu0 %v176_v19  ;;  %3060 = vmatmul.mubr.f32.vlgmr.msra.gmra.mxu1 %v132_v25  ;;  %v3546_v28 = vand.u32 4294901760, %v787_v24 }
  0x1b   :  { %3066 = vmatprep.subr.mxu0 %v183_v21  ;;  %3071 = vmatprep.subr.mxu1 %v3391_v4 }
  0x1c   :  { %3067 = vmatpush3.msra.mxu0 %v183_v21  ;;  %3068 = vmatprep.mubr.f32.mxu0 %v120_v13 }
  0x1d   :  { %3072 = vmatpush3.msra.mxu1 %v3391_v4  ;;  %3069 = vmatmul.mubr.f32.vlgmr.msra.gmra.mxu0 %v3411_v15 }
  0x1e   :  { %3073 = vmatprep.subr.mxu1 %v3393_v5  ;;  %3077 = vmatprep.mubr.f32.mxu1 %v120_v13  ;;  %v3499_v13 = vand.u32 4294901760, %v26_v12 }
  0x1f   :  { %3074 = vmatpush3.msra.mxu1 %v3393_v5  ;;  %v3344_v5 = vmov 0.0  }
  0x20   :  { %3075 = vmatprep.subr.mxu1 %v3395_v6  ;;  %3080 = vmatprep.subr.mxu0 %v3344_v5  ;;  %v3512_v17 = vsub.f32 %v26_v12, %v3499_v13 }
  0x21   :  { %3076 = vmatpush3.msra.mxu1 %v3395_v6  ;;  %v29_v6 = vld [vmem:[%s3861_s4 + $0x18] sm:$0xff]  ;;  %3088 = vmatprep.mubr.msk.f32.mxu0 %vm3345_vm2, %v3344_v5 }
  0x22   :  { %3078 = vmatmul.mubr.f32.vlgmr.msra.gmra.mxu1 %v3411_v15  ;;  %3091 = vmatprep.subr.mxu1 %v3344_v5  ;;  %v3486_v9 = vand.u32 4294901760, %v29_v6  ;;  %v3505_v15 = vsub.f32 %v28_v7, %v3488_v10  ;;  %v3526_v21 = vand.u32 4294901760, %v3512_v17 }
  0x23   :  { %3099 = vmatprep.mubr.msk.f32.mxu1 %vm3345_vm2, %v3344_v5 }
  0x24   :  { %v3502_v14 = vsub.f32 %v29_v6, %v3486_v9  ;;  %3081 = vmatpush3.msra.mxu0 %v3486_v9  ;;  %v3519_v19 = vand.u32 4294901760, %v3505_v15  ;;  %v794_v27 = vsub.f32 %v3512_v17, %v3526_v21 }
  0x25   :  { %3082 = vmatprep.subr.mxu0 %v3344_v5 }
  0x26   :  { %v3516_v18 = vand.u32 4294901760, %v3502_v14  ;;  %3083 = vmatpush3.msra.mxu0 %v3488_v10  ;;  %v780_v23 = vsub.f32 %v3505_v15, %v3519_v19  ;;  %v3550_v29 = vand.u32 4294901760, %v794_v27 }
  0x27   :  { %3084 = vmatprep.subr.mxu0 %v3344_v5 }
  0x28   :  { %v773_v22 = vsub.f32 %v3502_v14, %v3516_v18  ;;  %3085 = vmatpush3.msra.mxu0 %v3490_v11  ;;  %v3539_v26 = vand.u32 4294901760, %v780_v23 }
  0x29   :  { %3086 = vmatprep.subr.mxu0 %v3344_v5 }
  0x2a   :  { %v3537_v25 = vand.u32 4294901760, %v773_v22  ;;  %3087 = vmatpush3.msra.mxu0 %v3499_v13 }
  0x2b   :  { %3102 = vmatprep.subr.mxu0 %v3344_v5 }
  0x2c   :  { %3092 = vmatpush3.msra.mxu1 %v3537_v25 }
  0x2d   :  { %3093 = vmatprep.subr.mxu1 %v3344_v5 }
  0x2e   :  { %3094 = vmatpush3.msra.mxu1 %v3539_v26 }
  0x2f   :  { %3095 = vmatprep.subr.mxu1 %v3344_v5 }
  0x30   :  { %3096 = vmatpush3.msra.mxu1 %v3546_v28 }
  0x31   :  { %3097 = vmatprep.subr.mxu1 %v3344_v5 }
  0x32   :  { %3098 = vmatpush3.msra.mxu1 %v3550_v29 }
  0x33   :  { %3113 = vmatprep.subr.mxu1 %v3344_v5 }
  0x7f   :  { %v38_v35 = vpop.permute.xlu0 %37 }
  0xcf   :  { %v3435_v34 = vpop.f32.mrf.mxu0 }
  0xd1   :  { %v126_v36 = vpop.f32.mrf.mxu0 }
  0xd2   :  { %v3437_v37 = vpop.f32.mrf.mxu1  ;;  %v127_v38 = vadd.f32 %v126_v36, %v38_v35 }
  0xd4   :  { %v222_v39 = vpop.f32.mrf.mxu1 }
  0xd5   :  { %v3439_v40 = vpop.f32.mrf.mxu0  ;;  %v223_v42 = vadd.f32 %v222_v39, %v127_v38 }
  0xd7   :  { %v306_v43 = vpop.f32.mrf.mxu0 }
  0xd8   :  { %v307_v47 = vadd.f32 %v306_v43, %v223_v42 }
  0xda   :  { %v3441_v44 = vpop.f32.mrf.mxu1 }
  0xdc   :  { %v389_v46 = vpop.f32.mrf.mxu1 }
  0xdd   :  { %v3443_v48 = vpop.f32.mrf.mxu0  ;;  %v390_v49 = vadd.f32 %v389_v46, %v307_v47 }
  0xdf   :  { %v477_v52 = vpop.f32.mrf.mxu0 }
  0xe0   :  { %v478_v55 = vadd.f32 %v477_v52, %v390_v49 }
  0xe2   :  { %v3452_v54 = vpop.f32.mrf.mxu1 }
  0xe4   :  { %v557_v58 = vpop.f32.mrf.mxu1 }
  0xe5   :  { %v3461_v59 = vadd.f32 %v557_v58, %v478_v55 }
  0xe7   :  { %v611_v60 = vmul.f32 %v3455_v56, %v3461_v59  ;;  %v575_v61 = vmul.f32 %v3459_v57, %v3461_v59  ;;  %v570_v62 = vmul.f32 %v3461_v59, %v3461_v59 }
  0xe9   :  { %v613_v63 = vsel %vm577_vm1, %v611_v60, 0.0  ;;  %v578_v0 = vsel %vm577_vm1, %v575_v61, 0.0  ;;  %v612_v1 = vmul.f32 %v3455_v56, %v570_v62  ;;  %v576_v3 = vmul.f32 %v3459_v57, %v570_v62 }
  0xea   :  { %614 = vadd.xlane.f32.xlu0 %v613_v63  ;;  %579 = vadd.xlane.f32.xlu1 %v578_v0 }
  0xeb   :  { %v616_v2 = vsel %vm577_vm1, %v612_v1, 0.0  ;;  %v581_v4 = vsel %vm577_vm1, %v576_v3, 0.0 }
  0xee   :  { %617 = vadd.xlane.f32.xlu1 %v616_v2 }
  0xf2   :  { %582 = vadd.xlane.f32.xlu1 %v581_v4 }
 0x173   :  { %v615_v30 = vpop.xlane.xlu0 %614  ;;  %v580_v31 = vpop.xlane.xlu1 %579 }
 0x174   :  { %v619_v32 = vrot.slane %v615_v30, 4  ;;  %v584_v33 = vrot.slane %v580_v31, 4 }
 0x176   :  { %v620_v35 = vadd.f32 %v619_v32, %v615_v30  ;;  %v585_v36 = vadd.f32 %v584_v33, %v580_v31 }
 0x177   :  { %v618_v38 = vpop.xlane.xlu1 %617 }
 0x178   :  { %v621_v39 = vrot.slane %v620_v35, 2  ;;  %v586_v41 = vrot.slane %v585_v36, 2  ;;  %v625_v42 = vrot.slane %v618_v38, 4 }
 0x17a   :  { %v622_v43 = vadd.f32 %v621_v39, %v620_v35  ;;  %v587_v45 = vadd.f32 %v586_v41, %v585_v36  ;;  %v626_v46 = vadd.f32 %v625_v42, %v618_v38 }
 0x17b   :  { %v583_v47 = vpop.xlane.xlu1 %582 }
 0x17c   :  { %v623_v49 = vrot.slane %v622_v43, 1  ;;  %v627_v51 = vrot.slane %v626_v46, 2  ;;  %v590_v52 = vrot.slane %v583_v47, 4  ;;  %v588_v55 = vrot.slane %v587_v45, 1 }
 0x17e   :  { %v624_v58 = vadd.f32 %v623_v49, %v622_v43  ;;  %v628_v60 = vadd.f32 %v627_v51, %v626_v46  ;;  %v591_v61 = vadd.f32 %v590_v52, %v583_v47  ;;  %v589_v1 = vadd.f32 %v588_v55, %v587_v45  ;;  %v567_v55 = vld [vmem:[%s3862_s3] sm:$0xff] }
 0x180   :  { %v629_v62 = vrot.slane %v628_v60, 1  ;;  %v592_v63 = vrot.slane %v591_v61, 2  ;;  %v631_v0 = vmul.f32 0.0078125, %v624_v58  ;;  %v596_v6 = vmul.f32 0.0078125, %v589_v1 }
 0x182   :  { %v630_v2 = vadd.f32 %v629_v62, %v628_v60  ;;  %v593_v3 = vadd.f32 %v592_v63, %v591_v61  ;;  %v633_v4 = vmul.f32 %v631_v0, %v631_v0  ;;  %v598_v23 = vmul.f32 %v596_v6, %v596_v6  ;;  %v2877_v60 = vld [vmem:[%s3862_s3 + $0x8] sm:$0xff] }
 0x183   :  { %v636_v35 = vmul.f32 %v631_v0, %v3450_v53  ;;  %v601_v38 = vmul.f32 %v596_v6, %v3450_v53 }
 0x184   :  { %v632_v7 = vmul.f32 0.0078125, %v630_v2  ;;  %v594_v8 = vrot.slane %v593_v3, 1 }
 0x185   :  { %v638_v36 = vrot.slane %v636_v35, 1 }
 0x186   :  { %v634_v12 = vsub.f32 %v632_v7, %v633_v4  ;;  %v595_v22 = vadd.f32 %v594_v8, %v593_v3 }
 0x187   :  { %v640_v41 = vadd.f32 %v638_v36, %v601_v38 }
 0x188   :  { %v635_v24 = vmax.f32 %v634_v12, 0.0  ;;  %v597_v27 = vmul.f32 0.0078125, %v595_v22 }
 0x189   :  { %v651_v45 = vrot.slane %v640_v41, %v3445_v50 }
 0x18a   :  { %v641_v30 = vadd.f32 1e-05, %v635_v24  ;;  %v599_v31 = vsub.f32 %v597_v27, %v598_v23 }
 0x18b   :  { %v652_v51 = vsub.f32 %v3461_v59, %v651_v45 }
 0x18c   :  { %3326 = vrsqrt.f32 %v641_v30  ;;  %v600_v32 = vmax.f32 %v599_v31, 0.0 }
 0x18e   :  { %v603_v33 = vadd.f32 1e-05, %v600_v32 }
 0x190   :  { %3328 = vrsqrt.f32 %v603_v33 }
 0x199   :  { %v3327_v39 = vpop.eup %3326 }
 0x19a   :  { %v643_v42 = vmul.f32 %v3327_v39, %v3450_v53 }
 0x19c   :  { %v645_v47 = vrot.slane %v643_v42, 1  ;;  %v2879_v42 = vld [vmem:[%s3859_s2 + $0x10] sm:$0xff] }
 0x19d   :  { %v3329_v43 = vpop.eup %3328 }
 0x19e   :  { %v605_v46 = vmul.f32 %v3329_v43, %v3450_v53  ;;  %v2878_v43 = vld [vmem:[%s3858_s1 + $0x10] sm:$0xff] }
 0x19f   :  { %v1163_v45 = vsel %vm45_vm0, %v2878_v43, 0 }
 0x1a0   :  { %v647_v49 = vadd.f32 %v645_v47, %v605_v46  ;;  %v3626_v46 = vand.u32 4294901760, %v1163_v45 }
 0x1a2   :  { %v656_v52 = vrot.slane %v647_v49, %v3445_v50  ;;  %v1234_v47 = vsub.f32 %v1163_v45, %v3626_v46 }
 0x1a4   :  { %v657_v58 = vmul.f32 %v656_v52, %v652_v51  ;;  %v1235_v51 = vand.u32 4294901760, %v1234_v47 }
 0x1a6   :  { %v658_v61 = vmul.f32 %v657_v58, %v567_v55 }
 0x1a8   :  { %v659_v62 = vadd.f32 %v2877_v60, %v658_v61  ;;  %v1236_v60 = vsub.f32 %v1234_v47, %v1235_v51 }
 0x1aa   :  { %v3570_v63 = vmax.f32 %v659_v62, 0.0 }
 0x1ac   :  { %v664_v0 = vsel %vm577_vm1, %v3570_v63, 0  ;;  %v1195_v49 = vand.u32 4294901760, %v3570_v63 }
 0x1ad   :  { %v735_v1 = vand.u32 4294901760, %v664_v0 }
 0x1ae   :  { %v1278_v55 = vsub.f32 %v3570_v63, %v1195_v49 }
 0x1af   :  { %v736_v59 = vsub.f32 %v664_v0, %v735_v1  ;;  %3100 = vmatmul.mubr.f32.vlgmr.msra.gmra.mxu1 %v735_v1 }
 0x1b0   :  { %3114 = vmatpush3.msra.mxu1 %v3486_v9  ;;  %3121 = vmatprep.mubr.msk.f32.mxu1 %vm3345_vm2, %v3344_v5 }
 0x1b1   :  { %3115 = vmatprep.subr.mxu1 %v3344_v5  ;;  %v737_v2 = vand.u32 4294901760, %v736_v59 }
 0x1b2   :  { %3116 = vmatpush3.msra.mxu1 %v3488_v10 }
 0x1b3   :  { %3117 = vmatprep.subr.mxu1 %v3344_v5  ;;  %v738_v3 = vsub.f32 %v736_v59, %v737_v2 }
 0x1b4   :  { %3118 = vmatpush3.msra.mxu1 %v3490_v11 }
 0x1b5   :  { %3119 = vmatprep.subr.mxu1 %v3344_v5  ;;  %v739_v4 = vand.u32 4294901760, %v738_v3 }
 0x1b6   :  { %3120 = vmatpush3.msra.mxu1 %v3499_v13 }
 0x1b7   :  { %3122 = vmatmul.mubr.f32.vlgmr.msra.gmra.mxu1 %v737_v2  ;;  %3135 = vmatprep.subr.mxu1 %v3344_v5 }
 0x1b8   :  { %3089 = vmatmul.mubr.f32.vlgmr.msra.gmra.mxu0 %v739_v4  ;;  %3136 = vmatpush3.msra.mxu1 %v3486_v9 }
 0x1b9   :  { %3103 = vmatpush3.msra.mxu0 %v3502_v14  ;;  %3137 = vmatprep.subr.mxu1 %v3344_v5 }
 0x1ba   :  { %3104 = vmatprep.subr.mxu0 %v3344_v5  ;;  %3138 = vmatpush3.msra.mxu1 %v3488_v10 }
 0x1bb   :  { %3105 = vmatpush3.msra.mxu0 %v3505_v15  ;;  %3139 = vmatprep.subr.mxu1 %v3344_v5 }
 0x1bc   :  { %3106 = vmatprep.subr.mxu0 %v3344_v5  ;;  %3140 = vmatpush3.msra.mxu1 %v3490_v11 }
 0x1bd   :  { %3107 = vmatpush3.msra.mxu0 %v3508_v16  ;;  %3141 = vmatprep.subr.mxu1 %v3344_v5 }
 0x1be   :  { %3108 = vmatprep.subr.mxu0 %v3344_v5  ;;  %3110 = vmatprep.mubr.msk.f32.mxu0 %vm3345_vm2, %v3344_v5 }
 0x1bf   :  { %3109 = vmatpush3.msra.mxu0 %v3512_v17  ;;  %3142 = vmatpush3.msra.mxu1 %v3499_v13 }
 0x1c0   :  { %3143 = vmatprep.mubr.msk.f32.mxu1 %vm3345_vm2, %v3344_v5  ;;  %3111 = vmatmul.mubr.f32.vlgmr.msra.gmra.mxu0 %v736_v59  ;;  %v1237_v59 = vand.u32 4294901760, %v1236_v60 }
 0x1c1   :  { %3124 = vmatprep.subr.mxu0 %v3344_v5  ;;  %3144 = vmatmul.mubr.f32.vlgmr.msra.gmra.mxu1 %v735_v1 }
 0x1c2   :  { %3125 = vmatpush3.msra.mxu0 %v3516_v18  ;;  %3132 = vmatprep.mubr.msk.f32.mxu0 %vm3345_vm2, %v3344_v5 }
 0x1c3   :  { %3126 = vmatprep.subr.mxu0 %v3344_v5  ;;  %3155 = vmatprep.subr.mxu1 %v3344_v5 }
 0x1c4   :  { %3127 = vmatpush3.msra.mxu0 %v3519_v19  ;;  %3161 = vmatprep.mubr.msk.f32.mxu1 %vm3345_vm2, %v3344_v5 }
 0x1c5   :  { %3128 = vmatprep.subr.mxu0 %v3344_v5 }
 0x1c6   :  { %3129 = vmatpush3.msra.mxu0 %v3522_v20 }
 0x1c7   :  { %3130 = vmatprep.subr.mxu0 %v3344_v5 }
 0x1c8   :  { %3131 = vmatpush3.msra.mxu0 %v3526_v21 }
 0x1c9   :  { %3133 = vmatmul.mubr.f32.vlgmr.msra.gmra.mxu0 %v735_v1  ;;  %3146 = vmatprep.subr.mxu0 %v3344_v5  ;;  %v1279_v1 = vand.u32 4294901760, %v1278_v55 }
 0x1ca   :  { %3152 = vmatprep.mubr.msk.f32.mxu0 %vm3345_vm2, %v3344_v5 }
 0x26f   :  { %v832_v6 = vpop.f32.mrf.mxu1 }
 0x271   :  { %v3101_v7 = vpop.f32.mrf.mxu1 }
 0x277   :  { %v989_v8 = vpop.f32.mrf.mxu1 }
 0x278   :  { %v741_v12 = vpop.f32.mrf.mxu0 }
 0x279   :  { %v3123_v22 = vpop.f32.mrf.mxu1  ;;  %v833_v30 = vadd.f32 %v832_v6, %v741_v12  ;;  %v1280_v6 = vsub.f32 %v1278_v55, %v1279_v1 }
 0x27a   :  { %v3090_v23 = vpop.f32.mrf.mxu0 }
 0x280   :  { %v912_v24 = vpop.f32.mrf.mxu0 }
 0x281   :  { %v1147_v27 = vpop.f32.mrf.mxu1  ;;  %v913_v33 = vadd.f32 %v912_v24, %v833_v30 }
 0x282   :  { %v3112_v31 = vpop.f32.mrf.mxu0 }
 0x283   :  { %v3145_v32 = vpop.f32.mrf.mxu1  ;;  %v990_v35 = vadd.f32 %v989_v8, %v913_v33  ;;  %v1281_v8 = vand.u32 4294901760, %v1280_v6 }
 0x289   :  { %v1072_v36 = vpop.f32.mrf.mxu0 }
 0x28a   :  { %v1073_v38 = vadd.f32 %v1072_v36, %v990_v35 }
 0x28b   :  { %v3134_v39 = vpop.f32.mrf.mxu0 }
 0x28c   :  { %v1148_v41 = vadd.f32 %v1147_v27, %v1073_v38 }
 0x28e   :  { %1152 = vrot.lane.b32.xlu1 %v1148_v41, %s3346_s21  ;;  %v1198_v52 = vand.u32 4294901760, %v1148_v41 }
 0x290   :  { %v1285_v61 = vsub.f32 %v1148_v41, %v1198_v52 }
 0x292   :  { %1159 = vperm.xlu1 %3325, %v2879_v42   ;;  %v1286_v3 = vand.u32 4294901760, %v1285_v61 }
 0x294   :  { %v1287_v7 = vsub.f32 %v1285_v61, %v1286_v3 }
 0x296   :  { %v1288_v12 = vand.u32 4294901760, %v1287_v7 }
 0x300   :  { %v1153_v58 = vpop.permute.xlu1 %1152 }
 0x301   :  { %v1192_v62 = vand.u32 4294901760, %v1153_v58 }
 0x303   :  { %v1271_v0 = vsub.f32 %v1153_v58, %v1192_v62  ;;  %3147 = vmatpush3.msra.mxu0 %v1192_v62 }
 0x304   :  { %3148 = vmatprep.subr.mxu0 %v3344_v5 }
 0x305   :  { %v1272_v2 = vand.u32 4294901760, %v1271_v0  ;;  %3149 = vmatpush3.msra.mxu0 %v1195_v49 }
 0x306   :  { %3150 = vmatprep.subr.mxu0 %v3344_v5 }
 0x307   :  { %v1273_v4 = vsub.f32 %v1271_v0, %v1272_v2  ;;  %3151 = vmatpush3.msra.mxu0 %v1198_v52 }
 0x308   :  { %3164 = vmatprep.subr.mxu0 %v3344_v5  ;;  %3153 = vmatmul.mubr.f32.vlgmr.msra.gmra.mxu0 %v1237_v59 }
 0x309   :  { %v1274_v63 = vand.u32 4294901760, %v1273_v4  ;;  %3165 = vmatpush3.msra.mxu0 %v1271_v0  ;;  %3170 = vmatprep.mubr.msk.f32.mxu0 %vm3345_vm2, %v3344_v5 }
 0x30a   :  { %3166 = vmatprep.subr.mxu0 %v3344_v5 }
 0x30b   :  { %3156 = vmatpush3.msra.mxu1 %v1274_v63  ;;  %3167 = vmatpush3.msra.mxu0 %v1278_v55 }
 0x30c   :  { %3157 = vmatprep.subr.mxu1 %v3344_v5  ;;  %3168 = vmatprep.subr.mxu0 %v3344_v5 }
 0x30d   :  { %3158 = vmatpush3.msra.mxu1 %v1281_v8  ;;  %3169 = vmatpush3.msra.mxu0 %v1285_v61  ;;  %v34_v61 = vld [vmem:[%s3859_s2 + $0x8] sm:$0xff] }
 0x30e   :  { %3159 = vmatprep.subr.mxu1 %v3344_v5  ;;  %3182 = vmatprep.subr.mxu0 %v3344_v5 }
 0x30f   :  { %3160 = vmatpush3.msra.mxu1 %v1288_v12  ;;  %3171 = vmatmul.mubr.f32.vlgmr.msra.gmra.mxu0 %v1234_v47 }
 0x310   :  { %3183 = vmatpush3.msra.mxu0 %v1272_v2  ;;  %3162 = vmatmul.mubr.f32.vlgmr.msra.gmra.mxu1 %v3626_v46 }
 0x311   :  { %3173 = vmatprep.subr.mxu1 %v3344_v5  ;;  %3184 = vmatprep.subr.mxu0 %v3344_v5 }
 0x312   :  { %3174 = vmatpush3.msra.mxu1 %v1192_v62  ;;  %3185 = vmatpush3.msra.mxu0 %v1279_v1 }
 0x313   :  { %3175 = vmatprep.subr.mxu1 %v3344_v5  ;;  %3186 = vmatprep.subr.mxu0 %v3344_v5 }
 0x314   :  { %3176 = vmatpush3.msra.mxu1 %v1195_v49  ;;  %3187 = vmatpush3.msra.mxu0 %v1286_v3 }
 0x315   :  { %3177 = vmatprep.subr.mxu1 %v3344_v5  ;;  %3179 = vmatprep.mubr.msk.f32.mxu1 %vm3345_vm2, %v3344_v5 }
 0x316   :  { %3178 = vmatpush3.msra.mxu1 %v1198_v52  ;;  %3188 = vmatprep.mubr.msk.f32.mxu0 %vm3345_vm2, %v3344_v5 }
 0x317   :  { %3180 = vmatmul.mubr.f32.vlgmr.msra.gmra.mxu1 %v1235_v51  ;;  %3191 = vmatprep.subr.mxu1 %v3344_v5 }
 0x318   :  { %3192 = vmatpush3.msra.mxu1 %v1192_v62  ;;  %3189 = vmatmul.mubr.f32.vlgmr.msra.gmra.mxu0 %v3626_v46 }
 0x319   :  { %3193 = vmatprep.subr.mxu1 %v3344_v5  ;;  %3197 = vmatprep.mubr.msk.f32.mxu1 %vm3345_vm2, %v3344_v5 }
 0x31a   :  { %3194 = vmatpush3.msra.mxu1 %v1195_v49  ;;  %3200 = vmatprep.subr.mxu0 %v3344_v5 }
 0x31b   :  { %3195 = vmatprep.subr.mxu1 %v3344_v5  ;;  %3201 = vmatpush3.msra.mxu0 %v3486_v9 }
 0x31c   :  { %3196 = vmatpush3.msra.mxu1 %v1198_v52  ;;  %3202 = vmatprep.subr.mxu0 %v3344_v5 }
 0x31d   :  { %3198 = vmatmul.mubr.f32.vlgmr.msra.gmra.mxu1 %v3626_v46  ;;  %3211 = vmatprep.subr.mxu1 %v3344_v5 }
 0x31e   :  { %3212 = vmatpush3.msra.mxu1 %v3537_v25  ;;  %3219 = vmatprep.mubr.msk.f32.mxu1 %vm3345_vm2, %v3344_v5 }
 0x31f   :  { %3213 = vmatprep.subr.mxu1 %v3344_v5  ;;  %3203 = vmatpush3.msra.mxu0 %v3488_v10 }
 0x320   :  { %3214 = vmatpush3.msra.mxu1 %v3539_v26  ;;  %3204 = vmatprep.subr.mxu0 %v3344_v5  ;;  %v1160_v26 = vpop.permute.xlu1 %1159 }
 0x321   :  { %3215 = vmatprep.subr.mxu1 %v3344_v5  ;;  %3205 = vmatpush3.msra.mxu0 %v3490_v11 }
 0x322   :  { %3216 = vmatpush3.msra.mxu1 %v3546_v28  ;;  %3206 = vmatprep.subr.mxu0 %v3344_v5 }
 0x323   :  { %3217 = vmatprep.subr.mxu1 %v3344_v5  ;;  %3207 = vmatpush3.msra.mxu0 %v3499_v13 }
 0x324   :  { %3218 = vmatpush3.msra.mxu1 %v3550_v29  ;;  %3208 = vmatprep.mubr.msk.f32.mxu0 %vm3345_vm2, %v3344_v5 }
 0x325   :  { %3233 = vmatprep.subr.mxu1 %v3344_v5  ;;  %3222 = vmatprep.subr.mxu0 %v3344_v5 }
 0x3c8   :  { %v1239_v25 = vpop.f32.mrf.mxu0 }
 0x3c9   :  { %v1240_v23 = vadd.f32 %v1239_v25, %v1160_v26 }
 0x3ca   :  { %v3154_v22 = vpop.f32.mrf.mxu0 }
 0x3cf   :  { %v1403_v28 = vpop.f32.mrf.mxu0 }
 0x3d0   :  { %v1325_v24 = vpop.f32.mrf.mxu1 }
 0x3d1   :  { %v1326_v27 = vadd.f32 %v1325_v24, %v1240_v23  ;;  %v3172_v30 = vpop.f32.mrf.mxu0 }
 0x3d2   :  { %v3163_v31 = vpop.f32.mrf.mxu1 }
 0x3d3   :  { %v1404_v32 = vadd.f32 %v1403_v28, %v1326_v27 }
 0x3d7   :  { %v1479_v33 = vpop.f32.mrf.mxu1 }
 0x3d8   :  { %v1480_v35 = vadd.f32 %v1479_v33, %v1404_v32  ;;  %v1559_v29 = vpop.f32.mrf.mxu0 }
 0x3d9   :  { %v3181_v36 = vpop.f32.mrf.mxu1 }
 0x3da   :  { %v3190_v38 = vpop.f32.mrf.mxu0  ;;  %v1560_v39 = vadd.f32 %v1559_v29, %v1480_v35 }
 0x3dd   :  { %v1633_v41 = vpop.f32.mrf.mxu1 }
 0x3de   :  { %v3680_v42 = vadd.f32 %v1633_v41, %v1560_v39 }
 0x3df   :  { %v3199_v43 = vpop.f32.mrf.mxu1 }
 0x3e0   :  { %v1673_v45 = vmul.f32 %v3680_v42, %v3455_v56  ;;  %v1642_v46 = vmul.f32 %v3680_v42, %v3459_v57  ;;  %v1641_v47 = vmul.f32 %v3680_v42, %v3680_v42 }
 0x3e2   :  { %v1675_v49 = vsel %vm577_vm1, %v1673_v45, 0.0  ;;  %v1644_v51 = vsel %vm577_vm1, %v1642_v46, 0.0  ;;  %v1674_v52 = vmul.f32 %v1641_v47, %v3455_v56  ;;  %v1643_v58 = vmul.f32 %v1641_v47, %v3459_v57 }
 0x3e3   :  { %1676 = vadd.xlane.f32.xlu1 %v1675_v49  ;;  %1645 = vadd.xlane.f32.xlu0 %v1644_v51 }
 0x3e4   :  { %v1678_v55 = vsel %vm577_vm1, %v1674_v52, 0.0  ;;  %v1647_v60 = vsel %vm577_vm1, %v1643_v58, 0.0 }
 0x3e7   :  { %1679 = vadd.xlane.f32.xlu0 %v1678_v55 }
 0x3eb   :  { %1648 = vadd.xlane.f32.xlu0 %v1647_v60 }
 0x3f4   :  { %42 = vperm.xlu1 %3325, %v34_v61  }
 0x46c   :  { %v1677_v62 = vpop.xlane.xlu1 %1676  ;;  %v1646_v0 = vpop.xlane.xlu0 %1645 }
 0x46d   :  { %v1681_v1 = vrot.slane %v1677_v62, 4  ;;  %v1650_v59 = vrot.slane %v1646_v0, 4 }
 0x46f   :  { %v1682_v2 = vadd.f32 %v1681_v1, %v1677_v62  ;;  %v1651_v3 = vadd.f32 %v1650_v59, %v1646_v0 }
 0x470   :  { %v1680_v4 = vpop.xlane.xlu0 %1679 }
 0x471   :  { %v1683_v6 = vrot.slane %v1682_v2, 2  ;;  %v1652_v63 = vrot.slane %v1651_v3, 2  ;;  %v1687_v7 = vrot.slane %v1680_v4, 4 }
 0x473   :  { %v1684_v8 = vadd.f32 %v1683_v6, %v1682_v2  ;;  %v1653_v12 = vadd.f32 %v1652_v63, %v1651_v3  ;;  %v1688_v25 = vadd.f32 %v1687_v7, %v1680_v4 }
 0x474   :  { %v1649_v26 = vpop.xlane.xlu0 %1648 }
 0x475   :  { %v1685_v22 = vrot.slane %v1684_v8, 1  ;;  %v1689_v23 = vrot.slane %v1688_v25, 2  ;;  %v1654_v28 = vrot.slane %v1653_v12, 1  ;;  %v1656_v24 = vrot.slane %v1649_v26, 4 }
 0x477   :  { %v1686_v27 = vadd.f32 %v1685_v22, %v1684_v8  ;;  %v1690_v30 = vadd.f32 %v1689_v23, %v1688_v25  ;;  %v1657_v31 = vadd.f32 %v1656_v24, %v1649_v26  ;;  %v1655_v35 = vadd.f32 %v1654_v28, %v1653_v12  ;;  %v2880_v26 = vld [vmem:[%s3862_s3 + $0x10] sm:$0xff]  ;;  %v2881_v23 = vld [vmem:[%s3862_s3 + $0x18] sm:$0xff] }
 0x479   :  { %v1691_v32 = vrot.slane %v1690_v30, 1  ;;  %v1693_v33 = vmul.f32 0.0078125, %v1686_v27  ;;  %v1658_v29 = vrot.slane %v1657_v31, 2  ;;  %v1662_v41 = vmul.f32 0.0078125, %v1655_v35 }
 0x47b   :  { %v1692_v36 = vadd.f32 %v1691_v32, %v1690_v30  ;;  %v1659_v38 = vadd.f32 %v1658_v29, %v1657_v31  ;;  %v1695_v39 = vmul.f32 %v1693_v33, %v1693_v33  ;;  %v1664_v49 = vmul.f32 %v1662_v41, %v1662_v41 }
 0x47c   :  { %v1698_v62 = vmul.f32 %v1693_v33, %v3450_v53  ;;  %v1667_v1 = vmul.f32 %v1662_v41, %v3450_v53  ;;  %v2883_v41 = vld [vmem:[%s3859_s2 + $0x20] sm:$0xff] }
 0x47d   :  { %v1694_v43 = vmul.f32 0.0078125, %v1692_v36  ;;  %v1660_v45 = vrot.slane %v1659_v38, 1 }
 0x47e   :  { %v1700_v0 = vrot.slane %v1698_v62, 1 }
 0x47f   :  { %v1696_v46 = vsub.f32 %v1694_v43, %v1695_v39  ;;  %v1661_v47 = vadd.f32 %v1660_v45, %v1659_v38  ;;  %v43_v43 = vpop.permute.xlu1 %42 }
 0x480   :  { %v1702_v2 = vadd.f32 %v1700_v0, %v1667_v1  ;;  %v137_v45 = vadd.f32 %v3435_v34, %v43_v43 }
 0x481   :  { %v1697_v51 = vmax.f32 %v1696_v46, 0.0  ;;  %v1663_v52 = vmul.f32 0.0078125, %v1661_v47 }
 0x482   :  { %v1713_v6 = vrot.slane %v1702_v2, %v3445_v50  ;;  %v229_v46 = vadd.f32 %v3437_v37, %v137_v45  ;;  %v2882_v37 = vld [vmem:[%s3858_s1 + $0x20] sm:$0xff] }
 0x483   :  { %v1703_v55 = vadd.f32 1e-05, %v1697_v51  ;;  %v1665_v58 = vsub.f32 %v1663_v52, %v1664_v49 }
 0x484   :  { %v1714_v12 = vsub.f32 %v3680_v42, %v1713_v6  ;;  %v314_v47 = vadd.f32 %v3439_v40, %v229_v46  ;;  %v2225_v40 = vsel %vm45_vm0, %v2882_v37, 0 }
 0x485   :  { %3330 = vrsqrt.f32 %v1703_v55  ;;  %v1666_v60 = vmax.f32 %v1665_v58, 0.0 }
 0x486   :  { %v398_v49 = vadd.f32 %v3441_v44, %v314_v47  ;;  %v3780_v44 = vand.u32 4294901760, %v2225_v40 }
 0x487   :  { %v1669_v61 = vadd.f32 1e-05, %v1666_v60 }
 0x488   :  { %v484_v51 = vadd.f32 %v3443_v48, %v398_v49  ;;  %v2296_v48 = vsub.f32 %v2225_v40, %v3780_v44 }
 0x489   :  { %3332 = vrsqrt.f32 %v1669_v61 }
 0x48a   :  { %v3768_v52 = vadd.f32 %v3452_v54, %v484_v51  ;;  %v2297_v61 = vand.u32 4294901760, %v2296_v48 }
 0x48c   :  { %v2821_v55 = vmul.f32 %v3455_v56, %v3768_v52  ;;  %v2790_v60 = vmul.f32 %v3459_v57, %v3768_v52 }
 0x48e   :  { %v2823_v58 = vsel %vm577_vm1, %v2821_v55, 0.0  ;;  %v2792_v34 = vsel %vm577_vm1, %v2790_v60, 0.0 }
 0x492   :  { %v3331_v59 = vpop.eup %3330 }
 0x493   :  { %v1705_v3 = vmul.f32 %v3331_v59, %v3450_v53  ;;  %v2298_v59 = vsub.f32 %v2296_v48, %v2297_v61 }
 0x495   :  { %v1707_v7 = vrot.slane %v1705_v3, 1 }
 0x496   :  { %v3333_v4 = vpop.eup %3332 }
 0x497   :  { %v1671_v63 = vmul.f32 %v3333_v4, %v3450_v53 }
 0x499   :  { %v1709_v8 = vadd.f32 %v1707_v7, %v1671_v63  ;;  %v2299_v63 = vand.u32 4294901760, %v2298_v59 }
 0x49b   :  { %v1718_v25 = vrot.slane %v1709_v8, %v3445_v50 }
 0x49d   :  { %v1719_v22 = vmul.f32 %v1718_v25, %v1714_v12 }
 0x49f   :  { %v1720_v28 = vmul.f32 %v2880_v26, %v1719_v22 }
 0x4a1   :  { %v1721_v24 = vadd.f32 %v2881_v23, %v1720_v28 }
 0x4a3   :  { %v3710_v27 = vmax.f32 %v1721_v24, 0.0 }
 0x4a5   :  { %v1726_v53 = vsel %vm577_vm1, %v3710_v27, 0  ;;  %v2257_v54 = vand.u32 4294901760, %v3710_v27 }
 0x4a6   :  { %v1797_v30 = vand.u32 4294901760, %v1726_v53 }
 0x4a7   :  { %v2340_v0 = vsub.f32 %v3710_v27, %v2257_v54 }
 0x4a8   :  { %v1798_v42 = vsub.f32 %v1726_v53, %v1797_v30  ;;  %3220 = vmatmul.mubr.f32.vlgmr.msra.gmra.mxu1 %v1797_v30 }
 0x4a9   :  { %3234 = vmatpush3.msra.mxu1 %v3486_v9  ;;  %3241 = vmatprep.mubr.msk.f32.mxu1 %vm3345_vm2, %v3344_v5  ;;  %v2341_v6 = vand.u32 4294901760, %v2340_v0 }
 0x4aa   :  { %3235 = vmatprep.subr.mxu1 %v3344_v5  ;;  %v1799_v31 = vand.u32 4294901760, %v1798_v42 }
 0x4ab   :  { %3236 = vmatpush3.msra.mxu1 %v3488_v10  ;;  %v2342_v25 = vsub.f32 %v2340_v0, %v2341_v6 }
 0x4ac   :  { %3237 = vmatprep.subr.mxu1 %v3344_v5  ;;  %v1800_v32 = vsub.f32 %v1798_v42, %v1799_v31 }
 0x4ad   :  { %3238 = vmatpush3.msra.mxu1 %v3490_v11  ;;  %v2343_v23 = vand.u32 4294901760, %v2342_v25 }
 0x4ae   :  { %3239 = vmatprep.subr.mxu1 %v3344_v5  ;;  %v1801_v33 = vand.u32 4294901760, %v1800_v32 }
 0x4af   :  { %3240 = vmatpush3.msra.mxu1 %v3499_v13 }
 0x4b0   :  { %3242 = vmatmul.mubr.f32.vlgmr.msra.gmra.mxu1 %v1799_v31  ;;  %3255 = vmatprep.subr.mxu1 %v3344_v5 }
 0x4b1   :  { %3209 = vmatmul.mubr.f32.vlgmr.msra.gmra.mxu0 %v1801_v33  ;;  %3256 = vmatpush3.msra.mxu1 %v3486_v9 }
 0x4b2   :  { %3223 = vmatpush3.msra.mxu0 %v3502_v14  ;;  %3257 = vmatprep.subr.mxu1 %v3344_v5 }
 0x4b3   :  { %3224 = vmatprep.subr.mxu0 %v3344_v5  ;;  %3258 = vmatpush3.msra.mxu1 %v3488_v10 }
 0x4b4   :  { %3225 = vmatpush3.msra.mxu0 %v3505_v15  ;;  %3259 = vmatprep.subr.mxu1 %v3344_v5 }
 0x4b5   :  { %3226 = vmatprep.subr.mxu0 %v3344_v5  ;;  %3260 = vmatpush3.msra.mxu1 %v3490_v11 }
 0x4b6   :  { %3227 = vmatpush3.msra.mxu0 %v3508_v16  ;;  %3261 = vmatprep.subr.mxu1 %v3344_v5 }
 0x4b7   :  { %3228 = vmatprep.subr.mxu0 %v3344_v5  ;;  %3230 = vmatprep.mubr.msk.f32.mxu0 %vm3345_vm2, %v3344_v5 }
 0x4b8   :  { %3229 = vmatpush3.msra.mxu0 %v3512_v17  ;;  %3262 = vmatpush3.msra.mxu1 %v3499_v13 }
 0x4b9   :  { %3263 = vmatprep.mubr.msk.f32.mxu1 %vm3345_vm2, %v3344_v5  ;;  %3231 = vmatmul.mubr.f32.vlgmr.msra.gmra.mxu0 %v1798_v42 }
 0x4ba   :  { %3244 = vmatprep.subr.mxu0 %v3344_v5  ;;  %3264 = vmatmul.mubr.f32.vlgmr.msra.gmra.mxu1 %v1797_v30 }
 0x4bb   :  { %3245 = vmatpush3.msra.mxu0 %v3516_v18  ;;  %3252 = vmatprep.mubr.msk.f32.mxu0 %vm3345_vm2, %v3344_v5 }
 0x4bc   :  { %3246 = vmatprep.subr.mxu0 %v3344_v5  ;;  %3275 = vmatprep.subr.mxu1 %v3344_v5 }
 0x4bd   :  { %3247 = vmatpush3.msra.mxu0 %v3519_v19  ;;  %3281 = vmatprep.mubr.msk.f32.mxu1 %vm3345_vm2, %v3344_v5 }
 0x4be   :  { %3248 = vmatprep.subr.mxu0 %v3344_v5 }
 0x4bf   :  { %3249 = vmatpush3.msra.mxu0 %v3522_v20 }
 0x4c0   :  { %3250 = vmatprep.subr.mxu0 %v3344_v5 }
 0x4c1   :  { %3251 = vmatpush3.msra.mxu0 %v3526_v21 }
 0x4c2   :  { %3253 = vmatmul.mubr.f32.vlgmr.msra.gmra.mxu0 %v1797_v30  ;;  %3266 = vmatprep.subr.mxu0 %v3344_v5 }
 0x4c3   :  { %3272 = vmatprep.mubr.msk.f32.mxu0 %vm3345_vm2, %v3344_v5 }
 0x568   :  { %v1894_v9 = vpop.f32.mrf.mxu1 }
 0x56a   :  { %v3221_v10 = vpop.f32.mrf.mxu1 }
 0x570   :  { %v2051_v11 = vpop.f32.mrf.mxu1 }
 0x571   :  { %v1803_v13 = vpop.f32.mrf.mxu0 }
 0x572   :  { %v3243_v14 = vpop.f32.mrf.mxu1  ;;  %v1895_v18 = vadd.f32 %v1894_v9, %v1803_v13 }
 0x573   :  { %v3210_v15 = vpop.f32.mrf.mxu0 }
 0x579   :  { %v1974_v16 = vpop.f32.mrf.mxu0 }
 0x57a   :  { %v2209_v17 = vpop.f32.mrf.mxu1  ;;  %v1975_v35 = vadd.f32 %v1974_v16, %v1895_v18 }
 0x57b   :  { %v3232_v19 = vpop.f32.mrf.mxu0 }
 0x57c   :  { %v3265_v20 = vpop.f32.mrf.mxu1  ;;  %v2052_v29 = vadd.f32 %v2051_v11, %v1975_v35  ;;  %v2789_v19 = vmul.f32 %v3768_v52, %v3768_v52 }
 0x57e   :  { %v2822_v49 = vmul.f32 %v2789_v19, %v3455_v56 }
 0x580   :  { %v2826_v51 = vsel %vm577_vm1, %v2822_v49, 0.0 }
 0x582   :  { %v2134_v21 = vpop.f32.mrf.mxu0 }
 0x583   :  { %v2135_v36 = vadd.f32 %v2134_v21, %v2052_v29 }
 0x584   :  { %v3254_v38 = vpop.f32.mrf.mxu0 }
 0x585   :  { %v2210_v39 = vadd.f32 %v2209_v17, %v2135_v36 }
 0x587   :  { %2214 = vrot.lane.b32.xlu0 %v2210_v39, %s3346_s21  ;;  %v2260_v62 = vand.u32 4294901760, %v2210_v39 }
 0x589   :  { %v2347_v2 = vsub.f32 %v2210_v39, %v2260_v62  ;;  %v2791_v39 = vmul.f32 %v2789_v19, %v3459_v57 }
 0x58b   :  { %2221 = vperm.xlu0 %3324, %v2883_v41   ;;  %v2348_v8 = vand.u32 4294901760, %v2347_v2  ;;  %v2795_v43 = vsel %vm577_vm1, %v2791_v39, 0.0 }
 0x58d   :  { %v2349_v22 = vsub.f32 %v2347_v2, %v2348_v8 }
 0x58f   :  { %v2350_v28 = vand.u32 4294901760, %v2349_v22 }
 0x5aa   :  { %2824 = vadd.xlane.f32.xlu0 %v2823_v58 }
 0x5ae   :  { %2793 = vadd.xlane.f32.xlu0 %v2792_v34 }
 0x5f9   :  { %v2215_v1 = vpop.permute.xlu0 %2214 }
 0x5fa   :  { %v2254_v3 = vand.u32 4294901760, %v2215_v1 }
 0x5fc   :  { %v2333_v4 = vsub.f32 %v2215_v1, %v2254_v3  ;;  %3267 = vmatpush3.msra.mxu0 %v2254_v3 }
 0x5fd   :  { %3268 = vmatprep.subr.mxu0 %v3344_v5 }
 0x5fe   :  { %v2334_v7 = vand.u32 4294901760, %v2333_v4  ;;  %3269 = vmatpush3.msra.mxu0 %v2257_v54 }
 0x5ff   :  { %3270 = vmatprep.subr.mxu0 %v3344_v5 }
 0x600   :  { %v2335_v12 = vsub.f32 %v2333_v4, %v2334_v7  ;;  %3271 = vmatpush3.msra.mxu0 %v2260_v62 }
 0x601   :  { %3273 = vmatmul.mubr.f32.vlgmr.msra.gmra.mxu0 %v2299_v63  ;;  %3284 = vmatprep.subr.mxu0 %v3344_v5 }
 0x602   :  { %v2336_v26 = vand.u32 4294901760, %v2335_v12  ;;  %3285 = vmatpush3.msra.mxu0 %v2333_v4  ;;  %3290 = vmatprep.mubr.msk.f32.mxu0 %vm3345_vm2, %v3344_v5 }
 0x603   :  { %3286 = vmatprep.subr.mxu0 %v3344_v5 }
 0x604   :  { %3276 = vmatpush3.msra.mxu1 %v2336_v26  ;;  %3287 = vmatpush3.msra.mxu0 %v2340_v0 }
 0x605   :  { %3277 = vmatprep.subr.mxu1 %v3344_v5  ;;  %3288 = vmatprep.subr.mxu0 %v3344_v5 }
 0x606   :  { %3278 = vmatpush3.msra.mxu1 %v2343_v23  ;;  %3289 = vmatpush3.msra.mxu0 %v2347_v2  ;;  %v2222_v53 = vpop.permute.xlu0 %2221 }
 0x607   :  { %3279 = vmatprep.subr.mxu1 %v3344_v5  ;;  %3302 = vmatprep.subr.mxu0 %v3344_v5 }
 0x608   :  { %3280 = vmatpush3.msra.mxu1 %v2350_v28  ;;  %3291 = vmatmul.mubr.f32.vlgmr.msra.gmra.mxu0 %v2296_v48 }
 0x609   :  { %3303 = vmatpush3.msra.mxu0 %v2334_v7  ;;  %3282 = vmatmul.mubr.f32.vlgmr.msra.gmra.mxu1 %v3780_v44 }
 0x60a   :  { %3293 = vmatprep.subr.mxu1 %v3344_v5  ;;  %3304 = vmatprep.subr.mxu0 %v3344_v5 }
 0x60b   :  { %3294 = vmatpush3.msra.mxu1 %v2254_v3  ;;  %3305 = vmatpush3.msra.mxu0 %v2341_v6 }
 0x60c   :  { %3295 = vmatprep.subr.mxu1 %v3344_v5  ;;  %3306 = vmatprep.subr.mxu0 %v3344_v5 }
 0x60d   :  { %3296 = vmatpush3.msra.mxu1 %v2257_v54  ;;  %3307 = vmatpush3.msra.mxu0 %v2348_v8 }
 0x60e   :  { %3297 = vmatprep.subr.mxu1 %v3344_v5  ;;  %3299 = vmatprep.mubr.msk.f32.mxu1 %vm3345_vm2, %v3344_v5 }
 0x60f   :  { %3298 = vmatpush3.msra.mxu1 %v2260_v62  ;;  %3308 = vmatprep.mubr.msk.f32.mxu0 %vm3345_vm2, %v3344_v5 }
 0x610   :  { %3300 = vmatmul.mubr.f32.vlgmr.msra.gmra.mxu1 %v2297_v61  ;;  %3311 = vmatprep.subr.mxu1 %v3344_v5 }
 0x611   :  { %3312 = vmatpush3.msra.mxu1 %v2254_v3  ;;  %3309 = vmatmul.mubr.f32.vlgmr.msra.gmra.mxu0 %v3780_v44 }
 0x612   :  { %3313 = vmatprep.subr.mxu1 %v3344_v5  ;;  %3317 = vmatprep.mubr.msk.f32.mxu1 %vm3345_vm2, %v3344_v5 }
 0x613   :  { %3314 = vmatpush3.msra.mxu1 %v2257_v54 }
 0x614   :  { %3315 = vmatprep.subr.mxu1 %v3344_v5 }
 0x615   :  { %3316 = vmatpush3.msra.mxu1 %v2260_v62 }
 0x616   :  { %3318 = vmatmul.mubr.f32.vlgmr.msra.gmra.mxu1 %v3780_v44 }
 0x633   :  { %v2825_v55 = vpop.xlane.xlu0 %2824 }
 0x634   :  { %v2829_v37 = vrot.slane %v2825_v55, 4 }
 0x636   :  { %v2830_v44 = vadd.f32 %v2829_v37, %v2825_v55 }
 0x637   :  { %v2794_v58 = vpop.xlane.xlu0 %2793 }
 0x638   :  { %v2798_v60 = vrot.slane %v2794_v58, 4  ;;  %v2831_v59 = vrot.slane %v2830_v44, 2 }
 0x63a   :  { %v2799_v34 = vadd.f32 %v2798_v60, %v2794_v58  ;;  %v2832_v22 = vadd.f32 %v2831_v59, %v2830_v44 }
 0x63c   :  { %v2800_v40 = vrot.slane %v2799_v34, 2 }
 0x63e   :  { %v2801_v62 = vadd.f32 %v2800_v40, %v2799_v34 }
 0x640   :  { %v2802_v7 = vrot.slane %v2801_v62, 1 }
 0x6c1   :  { %v2301_v24 = vpop.f32.mrf.mxu0 }
 0x6c2   :  { %v2302_v42 = vadd.f32 %v2301_v24, %v2222_v53 }
 0x6c3   :  { %v3274_v27 = vpop.f32.mrf.mxu0 }
 0x6c8   :  { %v2465_v30 = vpop.f32.mrf.mxu0 }
 0x6c9   :  { %v2387_v31 = vpop.f32.mrf.mxu1 }
 0x6ca   :  { %v3292_v32 = vpop.f32.mrf.mxu0  ;;  %v2388_v33 = vadd.f32 %v2387_v31, %v2302_v42  ;;  %v2803_v42 = vadd.f32 %v2802_v7, %v2801_v62 }
 0x6cb   :  { %v3283_v9 = vpop.f32.mrf.mxu1 }
 0x6cc   :  { %v2466_v10 = vadd.f32 %v2465_v30, %v2388_v33  ;;  %v2833_v9 = vrot.slane %v2832_v22, 1  ;;  %v2810_v19 = vmul.f32 0.0078125, %v2803_v42 }
 0x6d0   :  { %v2541_v11 = vpop.f32.mrf.mxu1 }
 0x6d1   :  { %v2542_v13 = vadd.f32 %v2541_v11, %v2466_v10  ;;  %v2621_v14 = vpop.f32.mrf.mxu0 }
 0x6d2   :  { %v3301_v15 = vpop.f32.mrf.mxu1 }
 0x6d3   :  { %v3310_v16 = vpop.f32.mrf.mxu0  ;;  %v2622_v17 = vadd.f32 %v2621_v14, %v2542_v13 }
 0x6d6   :  { %v2695_v5 = vpop.f32.mrf.mxu1 }
 0x6d7   :  { %v3812_v18 = vadd.f32 %v2695_v5, %v2622_v17 }
 0x6d8   :  { %v3319_v20 = vpop.f32.mrf.mxu1 }
 0x6d9   :  { %v2735_v35 = vmul.f32 %v3812_v18, %v3455_v56  ;;  %v2704_v29 = vmul.f32 %v3812_v18, %v3459_v57  ;;  %v2703_v21 = vmul.f32 %v3812_v18, %v3812_v18 }
 0x6db   :  { %v2737_v36 = vsel %vm577_vm1, %v2735_v35, 0.0  ;;  %v2706_v38 = vsel %vm577_vm1, %v2704_v29, 0.0  ;;  %v2736_v41 = vmul.f32 %v2703_v21, %v3455_v56  ;;  %v2705_v46 = vmul.f32 %v2703_v21, %v3459_v57 }
 0x6dc   :  { %2738 = vadd.xlane.f32.xlu0 %v2737_v36  ;;  %2707 = vadd.xlane.f32.xlu1 %v2706_v38  ;;  %v2834_v36 = vadd.f32 %v2833_v9, %v2832_v22 }
 0x6dd   :  { %v2740_v45 = vsel %vm577_vm1, %v2736_v41, 0.0  ;;  %v2709_v47 = vsel %vm577_vm1, %v2705_v46, 0.0 }
 0x6de   :  { %v2841_v58 = vmul.f32 0.0078125, %v2834_v36 }
 0x6e0   :  { %2796 = vadd.xlane.f32.xlu1 %v2795_v43  ;;  %2741 = vadd.xlane.f32.xlu0 %v2740_v45  ;;  %v2843_v62 = vmul.f32 %v2841_v58, %v2841_v58 }
 0x6e4   :  { %2710 = vadd.xlane.f32.xlu0 %v2709_v47  ;;  %v2812_v47 = vmul.f32 %v2810_v19, %v2810_v19 }
 0x6e8   :  { %2827 = vadd.xlane.f32.xlu0 %v2826_v51 }
 0x765   :  { %v2739_v48 = vpop.xlane.xlu0 %2738  ;;  %v2708_v54 = vpop.xlane.xlu1 %2707 }
 0x766   :  { %v2743_v57 = vrot.slane %v2739_v48, 4  ;;  %v2712_v61 = vrot.slane %v2708_v54, 4 }
 0x768   :  { %v2744_v0 = vadd.f32 %v2743_v57, %v2739_v48  ;;  %v2713_v1 = vadd.f32 %v2712_v61, %v2708_v54 }
 0x769   :  { %v2797_v56 = vpop.xlane.xlu1 %2796  ;;  %v2742_v2 = vpop.xlane.xlu0 %2741 }
 0x76a   :  { %v2745_v3 = vrot.slane %v2744_v0, 2  ;;  %v2714_v4 = vrot.slane %v2713_v1, 2  ;;  %v2804_v6 = vrot.slane %v2797_v56, 4  ;;  %v2749_v63 = vrot.slane %v2742_v2, 4 }
 0x76c   :  { %v2746_v8 = vadd.f32 %v2745_v3, %v2744_v0  ;;  %v2715_v12 = vadd.f32 %v2714_v4, %v2713_v1  ;;  %v2805_v25 = vadd.f32 %v2804_v6, %v2797_v56  ;;  %v2750_v26 = vadd.f32 %v2749_v63, %v2742_v2  ;;  %v3342_v4 = vld [vmem:[%s3860_s5] sm:$0x3] }
 0x76d   :  { %v2711_v23 = vpop.xlane.xlu0 %2710 }
 0x76e   :  { %v2747_v28 = vrot.slane %v2746_v8, 1  ;;  %v2716_v24 = vrot.slane %v2715_v12, 1  ;;  %v2806_v27 = vrot.slane %v2805_v25, 2  ;;  %v2751_v53 = vrot.slane %v2750_v26, 2 }
 0x76f   :  { %v2718_v30 = vrot.slane %v2711_v23, 4 }
 0x770   :  { %v2748_v31 = vadd.f32 %v2747_v28, %v2746_v8  ;;  %v2807_v32 = vadd.f32 %v2806_v27, %v2805_v25  ;;  %v2752_v33 = vadd.f32 %v2751_v53, %v2750_v26  ;;  %v2717_v14 = vadd.f32 %v2716_v24, %v2715_v12 }
 0x771   :  { %v2719_v10 = vadd.f32 %v2718_v30, %v2711_v23  ;;  %v2828_v11 = vpop.xlane.xlu0 %2827  ;;  %v2846_v25 = vmul.f32 %v3342_v4, %v2841_v58  ;;  %v2815_v23 = vmul.f32 %v3342_v4, %v2810_v19 }
 0x772   :  { %v2755_v13 = vmul.f32 0.0078125, %v2748_v31  ;;  %v2808_v15 = vrot.slane %v2807_v32, 1  ;;  %v2753_v16 = vrot.slane %v2752_v33, 1  ;;  %v2835_v5 = vrot.slane %v2828_v11, 4 }
 0x773   :  { %v2720_v17 = vrot.slane %v2719_v10, 2  ;;  %v2724_v39 = vmul.f32 0.0078125, %v2717_v14  ;;  %v2848_v24 = vrot.slane %v2846_v25, 1 }
 0x774   :  { %v2809_v20 = vadd.f32 %v2808_v15, %v2807_v32  ;;  %v2754_v35 = vadd.f32 %v2753_v16, %v2752_v33  ;;  %v2836_v21 = vadd.f32 %v2835_v5, %v2828_v11  ;;  %v2757_v38 = vmul.f32 %v2755_v13, %v2755_v13 }
 0x775   :  { %v2721_v29 = vadd.f32 %v2720_v17, %v2719_v10  ;;  %v2726_v34 = vmul.f32 %v2724_v39, %v2724_v39  ;;  %v2760_v6 = vmul.f32 %v3342_v4, %v2755_v13  ;;  %v2729_v8 = vmul.f32 %v3342_v4, %v2724_v39  ;;  %v2884_v13 = vld [vmem:[%s3862_s3 + $0x20] sm:$0xff] }
 0x776   :  { %v2811_v41 = vmul.f32 0.0078125, %v2809_v20  ;;  %v2756_v43 = vmul.f32 0.0078125, %v2754_v35  ;;  %v2837_v46 = vrot.slane %v2836_v21, 2  ;;  %v2850_v31 = vadd.f32 %v2848_v24, %v2815_v23  ;;  %v2885_v20 = vld [vmem:[%s3862_s3 + $0x28] sm:$0xff] }
 0x777   :  { %v2722_v45 = vrot.slane %v2721_v29, 1  ;;  %v2762_v7 = vrot.slane %v2760_v6, 1 }
 0x778   :  { %v2758_v49 = vsub.f32 %v2756_v43, %v2757_v38  ;;  %v2838_v55 = vadd.f32 %v2837_v46, %v2836_v21  ;;  %v2813_v60 = vsub.f32 %v2811_v41, %v2812_v47  ;;  %v2861_v14 = vrot.slane %v2850_v31, %v3445_v50  ;;  %v2887_v38 = vld [vmem:[%s3862_s3 + $0x38] sm:$0xff] }
 0x779   :  { %v2723_v51 = vadd.f32 %v2722_v45, %v2721_v29  ;;  %v2764_v26 = vadd.f32 %v2762_v7, %v2729_v8  ;;  %v2886_v29 = vld [vmem:[%s3862_s3 + $0x30] sm:$0xff] }
 0x77a   :  { %v2759_v37 = vmax.f32 %v2758_v49, 0.0  ;;  %v2839_v44 = vrot.slane %v2838_v55, 1  ;;  %v2814_v61 = vmax.f32 %v2813_v60, 0.0 }
 0x77b   :  { %v2725_v40 = vmul.f32 0.0078125, %v2723_v51  ;;  %v2775_v27 = vrot.slane %v2764_v26, %v3445_v50 }
 0x77c   :  { %v2765_v48 = vadd.f32 1e-05, %v2759_v37  ;;  %v2840_v57 = vadd.f32 %v2839_v44, %v2838_v55  ;;  %v2817_v2 = vadd.f32 1e-05, %v2814_v61 }
 0x77d   :  { %v2727_v54 = vsub.f32 %v2725_v40, %v2726_v34  ;;  %v2776_v9 = vsub.f32 %v3812_v18, %v2775_v27  ;;  %v2862_v18 = vsub.f32 %v3768_v52, %v2861_v14 }
 0x77e   :  { %v2842_v1 = vmul.f32 0.0078125, %v2840_v57  ;;  %3334 = vrsqrt.f32 %v2765_v48 }
 0x77f   :  { %v2728_v0 = vmax.f32 %v2727_v54, 0.0 }
 0x780   :  { %v2844_v56 = vsub.f32 %v2842_v1, %v2843_v62 }
 0x781   :  { %v2731_v59 = vadd.f32 1e-05, %v2728_v0 }
 0x782   :  { %v2845_v3 = vmax.f32 %v2844_v56, 0.0 }
 0x783   :  { %3336 = vrsqrt.f32 %v2731_v59 }
 0x784   :  { %v2851_v63 = vadd.f32 1e-05, %v2845_v3  ;;  %3338 = vrsqrt.f32 %v2817_v2 }
 0x786   :  { %3340 = vrsqrt.f32 %v2851_v63 }
 0x78b   :  { %v3335_v12 = vpop.eup %3334 }
 0x78c   :  { %v2767_v22 = vmul.f32 %v3342_v4, %v3335_v12 }
 0x78e   :  { %v2769_v53 = vrot.slane %v2767_v22, 1 }
 0x790   :  { %v3337_v28 = vpop.eup %3336 }
 0x791   :  { %v2733_v30 = vmul.f32 %v3342_v4, %v3337_v28  ;;  %v3339_v42 = vpop.eup %3338 }
 0x792   :  { %v2819_v15 = vmul.f32 %v3342_v4, %v3339_v42 }
 0x793   :  { %v2771_v32 = vadd.f32 %v2769_v53, %v2733_v30  ;;  %v3341_v33 = vpop.eup %3340 }
 0x794   :  { %v2853_v11 = vmul.f32 %v3342_v4, %v3341_v33 }
 0x795   :  { %v2780_v10 = vrot.slane %v2771_v32, %v3445_v50 }
 0x796   :  { %v2855_v17 = vrot.slane %v2853_v11, 1 }
 0x797   :  { %v2781_v16 = vmul.f32 %v2780_v10, %v2776_v9 }
 0x798   :  { %v2857_v19 = vadd.f32 %v2855_v17, %v2819_v15 }
 0x799   :  { %v2782_v5 = vmul.f32 %v2884_v13, %v2781_v16 }
 0x79a   :  { %v2866_v35 = vrot.slane %v2857_v19, %v3445_v50 }
 0x79b   :  { %v2783_v21 = vadd.f32 %v2885_v20, %v2782_v5 }
 0x79c   :  { %v2867_v36 = vmul.f32 %v2866_v35, %v2862_v18 }
 0x79d   :  { %v2784_v41 = vmax.f32 %v2783_v21, 0.0 }
 0x79e   :  { %v2868_v39 = vmul.f32 %v2886_v29, %v2867_v36 }
 0x7a0   :  { %v2869_v43 = vadd.f32 %v2887_v38, %v2868_v39 }
 0x7a2   :  { %v2870_v45 = vadd.f32 %v2869_v43, %v2784_v41 }
 0x7a4   :  { %v2871_v46 = vmax.f32 %v2870_v45, 0.0 }
 0x7a6   :  { %2872 = vst.msk [vmem:[%s3863_s6] sm:$0xff] %vm577_vm1, %v2871_v46 }

</bundles_post_ra>
